<compile_context>
chip_gen: v6e
topology: v6e:2x2x1
jax: 0.10.0
libtpu: 0.0.40
codegen_flags: <defaults>
</compile_context>

<pallas_src>
import numpy as np
import jax
import jax.numpy as jnp
from jax.experimental import pallas as pl
from jax.experimental.pallas import tpu as pltpu

# ----------------------- fixed hyper-parameters (module defaults) ----------------
GRID_SHAPE = (31, 51)                    # (GH, GW) == grid_shape
GH, GW = GRID_SHAPE
PAD = min(GRID_SHAPE) - 1                # padding_size = 30
TY, TX = GH + 2 * PAD, GW + 2 * PAD      # total_shape = (91, 111)
KSIZE = 2 * PAD + 1                      # 61-tap Gaussian filter
# RecasensSaliencyToGridMixin builds the filter with *its* default attraction_fwhm=13;
# PlainKDEGrid's attraction_fwhm=4 is assigned afterwards and never used for the filter.
FILTER_FWHM = 13.0
BANDWIDTH_SCALE = 64.0
AMPLITUDE_SCALE = 1.0
WARP_SCALE = 1.0
UNIFORM = 1.0 / float(KSIZE * KSIZE)     # 1 / (2*pad+1)^2
_OFF = 128                               # lane offset of the "offsets" half of a band


# ----------------------- deterministic parameter setup ---------------------------
def _make1d_gaussian(size, fwhm):
    x = np.arange(0, size, 1, dtype=np.float64)
    c = size // 2
    return np.exp(-4.0 * np.log(2.0) * (x - c) ** 2 / fwhm ** 2)


_FILT = _make1d_gaussian(KSIZE, FILTER_FWHM)


def _conv_band(total_len, out_len):
    # F.conv1d (valid cross-correlation) as a matmul: out = x_pad @ B, B[t, j] = filt[t-j]
    B = np.zeros((total_len, out_len), np.float64)
    for j in range(out_len):
        B[j:j + KSIZE, j] = _FILT
    return B


def _reflect_pad_matrix(length, pad):
    # x_pad = x @ P reproduces F.pad(..., mode='reflect') for a length-`length` row.
    T = length + 2 * pad
    P = np.zeros((length, T), np.float64)
    for i in range(T):
        j = i - pad
        if j < 0:
            j = -j
        elif j >= length:
            j = 2 * length - 2 - j
        P[j, i] = 1.0
    return P


def _bilinear_matrix(n_in, n_out):
    # align_corners=True linear interpolation weights (rows sum to 1)
    Wm = np.zeros((n_out, n_in), np.float64)
    if n_out == 1:
        Wm[0, 0] = 1.0
        return Wm.astype(np.float32)
    for i in range(n_out):
        src = i * (n_in - 1) / (n_out - 1)
        i0 = min(int(np.floor(src)), n_in - 1)
        i1 = min(i0 + 1, n_in - 1)
        f = src - i0
        Wm[i, i0] += 1.0 - f
        Wm[i, i1] += f
    return Wm.astype(np.float32)


_PX = _reflect_pad_matrix(GW, PAD)                        # (GW, TX)
_PY = _reflect_pad_matrix(GH, PAD)                        # (GH, TY)
_BX = _conv_band(TX, GW)                                  # (TX, GW)
_BY = _conv_band(TY, GH)                                  # (TY, GH)
_PBX = (np.arange(TX, dtype=np.float64) - PAD) / (GW - 1.0)
_PBY = (np.arange(TY, dtype=np.float64) - PAD) / (GH - 1.0)

# Packed band matrices (reflect pad folded into the conv band):
#   columns [0, G)       -> weights band
#   columns [128, 128+G) -> offsets band  (lane-aligned slice inside the kernel)
_bx = np.zeros((GW, 2 * _OFF), np.float32)
_bx[:, :GW] = (_PX @ _BX).astype(np.float32)
_bx[:, _OFF:_OFF + GW] = ((_PX * _PBX[None, :]) @ _BX).astype(np.float32)
BAND_X = jnp.asarray(_bx)                                 # (GW, 256)

_by = np.zeros((GH, 2 * _OFF), np.float32)
_by[:, :GH] = (_PY @ _BY).astype(np.float32)
_by[:, _OFF:_OFF + GH] = ((_PY * _PBY[None, :]) @ _BY).astype(np.float32)
BAND_Y = jnp.asarray(_by)                                 # (GH, 256)


# ----------------------------- the fused Pallas kernel ----------------------------
def _kde_warp_grid_kernel(bb_ref, rm_ref, xs_ref, ys_ref, bandx_ref, bandy_ref,
                          wxt_ref, ymask_ref, wy_ref, o_ref, xint_scr, yg_scr):
    """KDE saliency -> separable conv -> rank-1 warp grid -> interleaved batched store.

    Grid is (N, n_row_tiles).  The rank-1 rows are computed once per image (row tile 0)
    into VMEM scratch; each step then stores one lane-dense (TH, 2*w_out) block of the
    final interleaved layout (even lanes = x, odd lanes = y) for the current image.
    """
    @pl.when(pl.program_id(1) == 0)
    def _():
        bb = bb_ref[...]                                    # (MP, 4) [x1, y1, x2, y2]
        rm = rm_ref[...]                                    # (MP, 1) 1 real / 0 padding
        wh = bb[:, 2:4] - bb[:, 0:2]                        # box width / height
        cx = bb[:, 0:1] + 0.5 * wh[:, 0:1]
        cy = bb[:, 1:2] + 0.5 * wh[:, 1:2]
        # divides only on tiny (MP, 1) vectors; clamp(w*scale, min=1) as in the reference
        inv_w = 1.0 / jnp.maximum(wh[:, 0:1] * BANDWIDTH_SCALE, 1.0)
        inv_h = 1.0 / jnp.maximum(wh[:, 1:2] * BANDWIDTH_SCALE, 1.0)

        dx = xs_ref[...] - cx                               # (MP, GW)
        fx = jnp.exp(-0.5 * (dx * dx) * inv_w)
        dy = ys_ref[...] - cy                               # (MP, GH)
        fy = jnp.exp(-0.5 * (dy * dy) * inv_h)

        sx = jnp.sum(fx, axis=1, keepdims=True)             # (MP, 1)
        sy = jnp.sum(fy, axis=1, keepdims=True)
        # reference eps: 1e-5 + sal.sum(dim=1) == 1e-5 + sx*sy (separable row-sum)
        coef = (AMPLITUDE_SCALE * rm) / (1e-5 + sx * sy)    # padded rows -> 0
        m_real = jnp.sum(rm, axis=0, keepdims=True)         # (1, 1) number of real boxes

        # TODO(synk): for very large box counts express these axis-0 reductions as
        # (1,MP)x(MP,G) matmuls tiled over MP; at MP ~ O(100) the XLU reduce is fine.
        x_kde = jnp.sum(fx * (coef * sy), axis=0, keepdims=True)      # (1, GW)
        y_kde = jnp.sum(fy * (coef * sx), axis=0, keepdims=True)      # (1, GH)
        kde_total = jnp.sum(coef * sx * sy, axis=0, keepdims=True)    # (1, 1)

        x_unnorm = x_kde + m_real * (UNIFORM * GH)
        y_unnorm = y_kde + m_real * (UNIFORM * GW)
        total = kde_total + m_real * (UNIFORM * GH * GW)

        has_boxes = m_real > 0.0
        inv_total = 1.0 / jnp.where(has_boxes, total, 1.0)
        # zero boxes -> uniform saliency fallback: marginals 1/GW and 1/GH
        x_sal = jnp.where(has_boxes, x_unnorm * inv_total, 1.0 / GW)  # (1, GW)
        y_sal = jnp.where(has_boxes, y_unnorm * inv_total, 1.0 / GH)  # (1, GH)

        # reflect pad + 61-tap conv1d folded into one packed band matmul per axis
        wxox = jnp.dot(x_sal, bandx_ref[...], preferred_element_type=jnp.float32)
        xg = jnp.clip(wxox[:, _OFF:_OFF + GW] / wxox[:, 0:GW] * 2.0 - 1.0, -1.0, 1.0)
        wyoy = jnp.dot(y_sal, bandy_ref[...], preferred_element_type=jnp.float32)
        yg = jnp.clip(wyoy[:, _OFF:_OFF + GH] / wyoy[:, 0:GH] * 2.0 - 1.0, -1.0, 1.0)

        # align_corners=True bilinear x-resize, pre-interleaved into even lanes of the
        # final (..., 2*w_out) layout (odd lanes stay 0); yg kept at grid resolution.
        xint_scr[...] = jnp.dot(xg, wxt_ref[...], preferred_element_type=jnp.float32)
        yg_scr[...] = yg

    # ---- every step: one lane-dense (TH, 2*w_out) block of the final layout --------
    y_col = jnp.sum(wy_ref[...] * yg_scr[...], axis=1, keepdims=True)   # (TH, 1)
    o_ref[...] = xint_scr[...] + y_col * ymask_ref[...]                 # (TH, 2*w_out)


# ----------------------------- forward wrapper -------------------------------------
def plain_kde_grid_forward(imgs, v_pts, gt_bboxes):
    """Equivalent of PlainKDEGrid.forward(imgs, v_pts, gt_bboxes, jitter=False).

    imgs: (N, C, H, W) float32 (only the shape is used, like the reference)
    v_pts: unused in the default configuration (warp_fovea_* flags are False)
    gt_bboxes: (M, 4) float32 boxes [x1, y1, x2, y2]
    returns: (N, H_out, W_out, 2) float32 sampling grid
    """
    del v_pts  # unused when warp_fovea_inst_scale / _l2 are False (defaults)
    # TODO(synk): reference's NaN-fallback / symmetry branches (host-side, data-dependent
    # control flow) are not reproduced; they are inactive for finite inputs & defaults.
    N, _, H, W = imgs.shape
    h_out, w_out = int(H * WARP_SCALE), int(W * WARP_SCALE)
    W2 = 2 * w_out
    m = int(gt_bboxes.shape[0])

    # bucketed box padding (power of two, floor 64) -> few distinct compiles over m
    MP = 64
    while MP < m:
        MP *= 2
    bb_p = jnp.zeros((MP, 4), jnp.float32)
    rmask = jnp.zeros((MP, 1), jnp.float32)
    if m > 0:
        bb_p = bb_p.at[:m].set(jnp.asarray(gt_bboxes, jnp.float32))
        rmask = rmask.at[:m].set(1.0)

    # grid point coordinates: X = linspace(0, W, GW), Y = linspace(0, H, GH)
    xs_row = jnp.asarray(np.linspace(0.0, float(W), GW, dtype=np.float32).reshape(1, GW))
    ys_row = jnp.asarray(np.linspace(0.0, float(H), GH, dtype=np.float32).reshape(1, GH))

    # Row tile: multiple of 8, output block (TH, 2*w_out) f32 kept <= ~2 MiB so the
    # double-buffered output stays well inside v5e's 16 MiB scoped-VMEM default.
    max_block_bytes = 2 * 1024 * 1024
    th_cap = max(8, ((max_block_bytes // (W2 * 4)) // 8) * 8)
    TH = min(((h_out + 7) // 8) * 8, th_cap)
    n_tiles = int(pl.cdiv(h_out, TH))
    h_pad = n_tiles * TH

    # interleaved bilinear x-resize (even output lanes only), odd-lane (y) mask,
    # and per-tile y-resize rows (padded to h_pad; pad rows give y=0 and their
    # out-of-range output rows are dropped by Pallas, so nothing reads them).
    wxt_inter = np.zeros((GW, W2), np.float32)
    wxt_inter[:, 0::2] = _bilinear_matrix(GW, w_out).T
    wy_rows = np.zeros((h_pad, GH), np.float32)
    wy_rows[:h_out] = _bilinear_matrix(GH, h_out)
    ymask = np.zeros((1, W2), np.float32)
    ymask[0, 1::2] = 1.0

    out = pl.pallas_call(
        _kde_warp_grid_kernel,
        out_shape=jax.ShapeDtypeStruct((N, h_out, W2), jnp.float32),
        grid_spec=pltpu.PrefetchScalarGridSpec(
            num_scalar_prefetch=0,
            grid=(N, n_tiles),
            in_specs=[
                pl.BlockSpec((MP, 4), lambda n, i: (0, 0)),          # boxes
                pl.BlockSpec((MP, 1), lambda n, i: (0, 0)),          # real-box mask
                pl.BlockSpec((1, GW), lambda n, i: (0, 0)),          # x grid coords
                pl.BlockSpec((1, GH), lambda n, i: (0, 0)),          # y grid coords
                pl.BlockSpec((GW, 2 * _OFF), lambda n, i: (0, 0)),   # packed x band
                pl.BlockSpec((GH, 2 * _OFF), lambda n, i: (0, 0)),   # packed y band
                pl.BlockSpec((GW, W2), lambda n, i: (0, 0)),         # interleaved x resize
                pl.BlockSpec((1, W2), lambda n, i: (0, 0)),          # odd-lane (y) mask
                pl.BlockSpec((TH, GH), lambda n, i: (i, 0)),         # y resize rows / tile
            ],
            out_specs=pl.BlockSpec((None, TH, W2), lambda n, i: (n, i, 0)),
            scratch_shapes=[pltpu.VMEM((1, W2), jnp.float32),        # interleaved x row
                            pltpu.VMEM((1, GH), jnp.float32)],       # yg at grid res
        ),
        compiler_params=pltpu.CompilerParams(
            dimension_semantics=("parallel", "arbitrary")),
    )(bb_p, rmask, xs_row, ys_row, BAND_X, BAND_Y,
      jnp.asarray(wxt_inter), jnp.asarray(ymask), jnp.asarray(wy_rows))

    # free row-major reshape: even lanes -> channel 0 (x), odd lanes -> channel 1 (y)
    return out.reshape(N, h_out, w_out, 2)


# ----------------------------- numpy reference (float64) ---------------------------
def _reference_grid_np(imgs_shape, gt_bboxes, h_out, w_out):
    """Direct float64 re-implementation of PlainKDEGrid.forward (defaults, jitter=False)."""
    N, _, H, W = imgs_shape
    b = np.asarray(gt_bboxes, np.float64)
    m = b.shape[0]
    if m == 0:
        sal2d = np.full((GH, GW), 1.0 / (GH * GW))
    else:
        wh = b[:, 2:4] - b[:, 0:2]
        cxy = b[:, 0:2] + 0.5 * wh
        widths = np.maximum(wh[:, 0:1] * BANDWIDTH_SCALE, 1.0)
        heights = np.maximum(wh[:, 1:2] * BANDWIDTH_SCALE, 1.0)
        Xl = np.linspace(0.0, float(W), GW)
        Yl = np.linspace(0.0, float(H), GH)
        gx = np.repeat(Xl, GH)                 # torch.meshgrid(X, Y) flatten order
        gy = np.tile(Yl, GW)
        d = ((gx[None, :] - cxy[:, 0:1]) ** 2 / widths
             + (gy[None, :] - cxy[:, 1:2]) ** 2 / heights)
        sal = np.exp(-0.5 * d)
        sal = AMPLITUDE_SCALE * sal / (1e-5 + sal.sum(1, keepdims=True))
        sal = sal + UNIFORM
        sal = sal.sum(0)
        sal = sal / sal.sum()
        sal2d = sal.reshape(GW, GH).T          # (GH, GW)
    x_sal = sal2d.sum(0)
    y_sal = sal2d.sum(1)

    def reflect_pad(v, p):
        return np.concatenate([v[1:p + 1][::-1], v, v[-p - 1:-1][::-1]])

    def conv_valid(v):
        L = v.shape[0] - KSIZE + 1
        return np.array([np.dot(v[j:j + KSIZE], _FILT) for j in range(L)])

    xp = reflect_pad(x_sal, PAD)
    yp = reflect_pad(y_sal, PAD)
    xg = np.clip(conv_valid(xp * _PBX) / conv_valid(xp) * 2.0 - 1.0, -1.0, 1.0)
    yg = np.clip(conv_valid(yp * _PBY) / conv_valid(yp) * 2.0 - 1.0, -1.0, 1.0)

    x_row = _bilinear_matrix(GW, w_out).astype(np.float64) @ xg   # (w_out,)
    y_col = _bilinear_matrix(GH, h_out).astype(np.float64) @ yg   # (h_out,)
    g = np.zeros((h_out, w_out, 2))
    g[..., 0] = x_row[None, :]
    g[..., 1] = y_col[:, None]
    return np.broadcast_to(g[None], (N, h_out, w_out, 2))


# ----------------------------------- demo ------------------------------------------
if __name__ == "__main__":
    key = jax.random.PRNGKey(0)
    k1, k2, k3 = jax.random.split(key, 3)

    N, C, H, W = 2, 4, 16, 16
    imgs = jax.random.normal(k1, (N, C, H, W), jnp.float32)
    v_pts = jnp.array([8.0, 8.0], jnp.float32)            # unused in default config

    M = 5
    xy1 = jax.random.uniform(k2, (M, 2), jnp.float32, 0.0, 8.0)
    wh = jax.random.uniform(k3, (M, 2), jnp.float32, 1.0, 8.0)
    gt_bboxes = jnp.concatenate([xy1, xy1 + wh], axis=1)  # (M, 4) [x1, y1, x2, y2]

    grid = plain_kde_grid_forward(imgs, v_pts, gt_bboxes)
    grid = jax.block_until_ready(grid)

    assert grid.shape == (N, H, W, 2), grid.shape
    g_np = np.asarray(grid)
    assert np.all(np.isfinite(g_np))
    assert np.all(g_np >= -1.0) and np.all(g_np <= 1.0)

    ref = _reference_grid_np((N, C, H, W), np.asarray(gt_bboxes), H, W)
    assert np.allclose(g_np, ref, rtol=2e-3, atol=2e-3), float(np.max(np.abs(g_np - ref)))
    print("KERNEL_OK")
</pallas_src>

<mosaic_0001>
module attributes {stable_mosaic.version = 11 : i64} {
  func.func @_kde_warp_grid_kernel(%arg0: i32, %arg1: i32, %arg2: memref<64x4xf32, #tpu.memory_space<vmem>>, %arg3: memref<64x1xf32, #tpu.memory_space<vmem>>, %arg4: memref<1x51xf32, #tpu.memory_space<vmem>>, %arg5: memref<1x31xf32, #tpu.memory_space<vmem>>, %arg6: memref<51x256xf32, #tpu.memory_space<vmem>>, %arg7: memref<31x256xf32, #tpu.memory_space<vmem>>, %arg8: memref<51x32xf32, #tpu.memory_space<vmem>>, %arg9: memref<1x32xf32, #tpu.memory_space<vmem>>, %arg10: memref<16x31xf32, #tpu.memory_space<vmem>>, %arg11: memref<1x16x32xf32, #tpu.memory_space<vmem>>, %arg12: memref<1x32xf32, #tpu.memory_space<vmem>>, %arg13: memref<1x31xf32, #tpu.memory_space<vmem>>) attributes {dimension_semantics = [#tpu.dimension_semantics<parallel>, #tpu.dimension_semantics<arbitrary>], iteration_bounds = array<i64: 2, 1>, scalar_prefetch = 0 : i64, scratch_operands = 2 : i64, tpu.core_type = #tpu.core_type<tc>, window_params = [{pipeline_mode = #tpu.pipeline_mode<synchronous>, transform_indices = @transform_0, window_bounds = array<i64: 64, 4>}, {pipeline_mode = #tpu.pipeline_mode<synchronous>, transform_indices = @transform_1, window_bounds = array<i64: 64, 1>}, {pipeline_mode = #tpu.pipeline_mode<synchronous>, transform_indices = @transform_2, window_bounds = array<i64: 1, 51>}, {pipeline_mode = #tpu.pipeline_mode<synchronous>, transform_indices = @transform_3, window_bounds = array<i64: 1, 31>}, {pipeline_mode = #tpu.pipeline_mode<synchronous>, transform_indices = @transform_4, window_bounds = array<i64: 51, 256>}, {pipeline_mode = #tpu.pipeline_mode<synchronous>, transform_indices = @transform_5, window_bounds = array<i64: 31, 256>}, {pipeline_mode = #tpu.pipeline_mode<synchronous>, transform_indices = @transform_6, window_bounds = array<i64: 51, 32>}, {pipeline_mode = #tpu.pipeline_mode<synchronous>, transform_indices = @transform_7, window_bounds = array<i64: 1, 32>}, {transform_indices = @transform_8, window_bounds = array<i64: 16, 31>}, {transform_indices = @transform_9, window_bounds = array<i64: 1, 16, 32>}]} {
    %c0_i32 = arith.constant 0 : i32
    %0 = arith.cmpi eq, %arg1, %c0_i32 : i32
    %1 = arith.extui %0 : i1 to i32
    %c0_i32_0 = arith.constant 0 : i32
    %2 = arith.cmpi ne, %1, %c0_i32_0 : i32
    scf.if %2 {
      %c0_11 = arith.constant 0 : index
      %c0_12 = arith.constant 0 : index
      %19 = vector.load %arg2[%c0_11, %c0_12] : memref<64x4xf32, #tpu.memory_space<vmem>>, vector<64x4xf32>
      %c0_13 = arith.constant 0 : index
      %c0_14 = arith.constant 0 : index
      %20 = vector.load %arg3[%c0_13, %c0_14] : memref<64x1xf32, #tpu.memory_space<vmem>>, vector<64x1xf32>
      %21 = vector.extract_strided_slice %19 {offsets = [0, 2], sizes = [64, 2], strides = [1, 1]} : vector<64x4xf32> to vector<64x2xf32>
      %22 = vector.extract_strided_slice %19 {offsets = [0, 0], sizes = [64, 2], strides = [1, 1]} : vector<64x4xf32> to vector<64x2xf32>
      %23 = arith.subf %21, %22 : vector<64x2xf32>
      %24 = vector.extract_strided_slice %19 {offsets = [0, 0], sizes = [64, 1], strides = [1, 1]} : vector<64x4xf32> to vector<64x1xf32>
      %25 = vector.extract_strided_slice %23 {offsets = [0, 0], sizes = [64, 1], strides = [1, 1]} : vector<64x2xf32> to vector<64x1xf32>
      %cst_15 = arith.constant 5.000000e-01 : f32
      %26 = vector.broadcast %cst_15 : f32 to vector<64x1xf32>
      %27 = arith.mulf %26, %25 : vector<64x1xf32>
      %28 = arith.addf %24, %27 : vector<64x1xf32>
      %29 = vector.extract_strided_slice %19 {offsets = [0, 1], sizes = [64, 1], strides = [1, 1]} : vector<64x4xf32> to vector<64x1xf32>
      %30 = vector.extract_strided_slice %23 {offsets = [0, 1], sizes = [64, 1], strides = [1, 1]} : vector<64x2xf32> to vector<64x1xf32>
      %cst_16 = arith.constant 5.000000e-01 : f32
      %31 = vector.broadcast %cst_16 : f32 to vector<64x1xf32>
      %32 = arith.mulf %31, %30 : vector<64x1xf32>
      %33 = arith.addf %29, %32 : vector<64x1xf32>
      %34 = vector.extract_strided_slice %23 {offsets = [0, 0], sizes = [64, 1], strides = [1, 1]} : vector<64x2xf32> to vector<64x1xf32>
      %cst_17 = arith.constant 6.400000e+01 : f32
      %35 = vector.broadcast %cst_17 : f32 to vector<64x1xf32>
      %36 = arith.mulf %34, %35 : vector<64x1xf32>
      %cst_18 = arith.constant 1.000000e+00 : f32
      %37 = vector.broadcast %cst_18 : f32 to vector<64x1xf32>
      %38 = arith.maximumf %36, %37 : vector<64x1xf32>
      %cst_19 = arith.constant 1.000000e+00 : f32
      %39 = vector.broadcast %cst_19 : f32 to vector<64x1xf32>
      %40 = arith.divf %39, %38 : vector<64x1xf32>
      %41 = vector.extract_strided_slice %23 {offsets = [0, 1], sizes = [64, 1], strides = [1, 1]} : vector<64x2xf32> to vector<64x1xf32>
      %cst_20 = arith.constant 6.400000e+01 : f32
      %42 = vector.broadcast %cst_20 : f32 to vector<64x1xf32>
      %43 = arith.mulf %41, %42 : vector<64x1xf32>
      %cst_21 = arith.constant 1.000000e+00 : f32
      %44 = vector.broadcast %cst_21 : f32 to vector<64x1xf32>
      %45 = arith.maximumf %43, %44 : vector<64x1xf32>
      %cst_22 = arith.constant 1.000000e+00 : f32
      %46 = vector.broadcast %cst_22 : f32 to vector<64x1xf32>
      %47 = arith.divf %46, %45 : vector<64x1xf32>
      %c0_23 = arith.constant 0 : index
      %c0_24 = arith.constant 0 : index
      %48 = vector.load %arg4[%c0_23, %c0_24] : memref<1x51xf32, #tpu.memory_space<vmem>>, vector<1x51xf32>
      %49 = vector.broadcast %48 : vector<1x51xf32> to vector<64x51xf32>
      %50 = vector.broadcast %28 : vector<64x1xf32> to vector<64x51xf32>
      %51 = arith.subf %49, %50 : vector<64x51xf32>
      %52 = arith.mulf %51, %51 : vector<64x51xf32>
      %cst_25 = arith.constant -5.000000e-01 : f32
      %53 = vector.broadcast %cst_25 : f32 to vector<64x51xf32>
      %54 = arith.mulf %53, %52 : vector<64x51xf32>
      %55 = vector.broadcast %40 : vector<64x1xf32> to vector<64x51xf32>
      %56 = arith.mulf %54, %55 : vector<64x51xf32>
      %57 = math.exp %56 : vector<64x51xf32>
      %c0_26 = arith.constant 0 : index
      %c0_27 = arith.constant 0 : index
      %58 = vector.load %arg5[%c0_26, %c0_27] : memref<1x31xf32, #tpu.memory_space<vmem>>, vector<1x31xf32>
      %59 = vector.broadcast %58 : vector<1x31xf32> to vector<64x31xf32>
      %60 = vector.broadcast %33 : vector<64x1xf32> to vector<64x31xf32>
      %61 = arith.subf %59, %60 : vector<64x31xf32>
      %62 = arith.mulf %61, %61 : vector<64x31xf32>
      %cst_28 = arith.constant -5.000000e-01 : f32
      %63 = vector.broadcast %cst_28 : f32 to vector<64x31xf32>
      %64 = arith.mulf %63, %62 : vector<64x31xf32>
      %65 = vector.broadcast %47 : vector<64x1xf32> to vector<64x31xf32>
      %66 = arith.mulf %64, %65 : vector<64x31xf32>
      %67 = math.exp %66 : vector<64x31xf32>
      %cst_29 = arith.constant dense<0.000000e+00> : vector<64xf32>
      %68 = vector.multi_reduction <add>, %57, %cst_29 [1] : vector<64x51xf32> to vector<64xf32>
      %69 = vector.shape_cast %68 : vector<64xf32> to vector<64x1xf32>
      %cst_30 = arith.constant dense<0.000000e+00> : vector<64xf32>
      %70 = vector.multi_reduction <add>, %67, %cst_30 [1] : vector<64x31xf32> to vector<64xf32>
      %71 = vector.shape_cast %70 : vector<64xf32> to vector<64x1xf32>
      %cst_31 = arith.constant 1.000000e+00 : f32
      %72 = vector.broadcast %cst_31 : f32 to vector<64x1xf32>
      %73 = arith.mulf %72, %20 : vector<64x1xf32>
      %74 = arith.mulf %69, %71 : vector<64x1xf32>
      %cst_32 = arith.constant 9.99999974E-6 : f32
      %75 = vector.broadcast %cst_32 : f32 to vector<64x1xf32>
      %76 = arith.addf %75, %74 : vector<64x1xf32>
      %77 = arith.divf %73, %76 : vector<64x1xf32>
      %cst_33 = arith.constant dense<0.000000e+00> : vector<1xf32>
      %78 = vector.multi_reduction <add>, %20, %cst_33 [0] : vector<64x1xf32> to vector<1xf32>
      %79 = vector.shape_cast %78 : vector<1xf32> to vector<1x1xf32>
      %80 = arith.mulf %77, %71 : vector<64x1xf32>
      %81 = vector.broadcast %80 : vector<64x1xf32> to vector<64x51xf32>
      %82 = arith.mulf %57, %81 : vector<64x51xf32>
      %cst_34 = arith.constant dense<0.000000e+00> : vector<51xf32>
      %83 = vector.multi_reduction <add>, %82, %cst_34 [0] : vector<64x51xf32> to vector<51xf32>
      %84 = vector.shape_cast %83 : vector<51xf32> to vector<1x51xf32>
      %85 = arith.mulf %77, %69 : vector<64x1xf32>
      %86 = vector.broadcast %85 : vector<64x1xf32> to vector<64x31xf32>
      %87 = arith.mulf %67, %86 : vector<64x31xf32>
      %cst_35 = arith.constant dense<0.000000e+00> : vector<31xf32>
      %88 = vector.multi_reduction <add>, %87, %cst_35 [0] : vector<64x31xf32> to vector<31xf32>
      %89 = vector.shape_cast %88 : vector<31xf32> to vector<1x31xf32>
      %90 = arith.mulf %77, %69 : vector<64x1xf32>
      %91 = arith.mulf %90, %71 : vector<64x1xf32>
      %cst_36 = arith.constant dense<0.000000e+00> : vector<1xf32>
      %92 = vector.multi_reduction <add>, %91, %cst_36 [0] : vector<64x1xf32> to vector<1xf32>
      %93 = vector.shape_cast %92 : vector<1xf32> to vector<1x1xf32>
      %cst_37 = arith.constant 0.00833109393 : f32
      %94 = vector.broadcast %cst_37 : f32 to vector<1x1xf32>
      %95 = arith.mulf %79, %94 : vector<1x1xf32>
      %96 = vector.broadcast %95 : vector<1x1xf32> to vector<1x51xf32>
      %97 = arith.addf %84, %96 : vector<1x51xf32>
      %cst_38 = arith.constant 0.0137059931 : f32
      %98 = vector.broadcast %cst_38 : f32 to vector<1x1xf32>
      %99 = arith.mulf %79, %98 : vector<1x1xf32>
      %100 = vector.broadcast %99 : vector<1x1xf32> to vector<1x31xf32>
      %101 = arith.addf %89, %100 : vector<1x31xf32>
      %cst_39 = arith.constant 0.42488578 : f32
      %102 = vector.broadcast %cst_39 : f32 to vector<1x1xf32>
      %103 = arith.mulf %79, %102 : vector<1x1xf32>
      %104 = arith.addf %93, %103 : vector<1x1xf32>
      %cst_40 = arith.constant 0.000000e+00 : f32
      %105 = vector.broadcast %cst_40 : f32 to vector<1x1xf32>
      %106 = arith.cmpf ogt, %79, %105 : vector<1x1xf32>
      %cst_41 = arith.constant 1.000000e+00 : f32
      %107 = vector.broadcast %cst_41 : f32 to vector<1x1xf32>
      %108 = arith.select %106, %104, %107 : vector<1x1xi1>, vector<1x1xf32>
      %cst_42 = arith.constant 1.000000e+00 : f32
      %109 = vector.broadcast %cst_42 : f32 to vector<1x1xf32>
      %110 = arith.divf %109, %108 : vector<1x1xf32>
      %111 = vector.broadcast %110 : vector<1x1xf32> to vector<1x51xf32>
      %112 = arith.mulf %97, %111 : vector<1x51xf32>
      %cst_43 = arith.constant 0.0196078438 : f32
      %113 = vector.shape_cast %106 : vector<1x1xi1> to vector<1x1xi1>
      %114 = vector.broadcast %113 : vector<1x1xi1> to vector<1x51xi1>
      %115 = vector.broadcast %cst_43 : f32 to vector<1x51xf32>
      %116 = arith.select %114, %112, %115 : vector<1x51xi1>, vector<1x51xf32>
      %117 = vector.broadcast %110 : vector<1x1xf32> to vector<1x31xf32>
      %118 = arith.mulf %101, %117 : vector<1x31xf32>
      %cst_44 = arith.constant 0.0322580636 : f32
      %119 = vector.shape_cast %106 : vector<1x1xi1> to vector<1x1xi1>
      %120 = vector.broadcast %119 : vector<1x1xi1> to vector<1x31xi1>
      %121 = vector.broadcast %cst_44 : f32 to vector<1x31xf32>
      %122 = arith.select %120, %118, %121 : vector<1x31xi1>, vector<1x31xf32>
      %c0_45 = arith.constant 0 : index
      %c0_46 = arith.constant 0 : index
      %123 = vector.load %arg6[%c0_45, %c0_46] : memref<51x256xf32, #tpu.memory_space<vmem>>, vector<51x256xf32>
      %cst_47 = arith.constant dense<0.000000e+00> : vector<1x256xf32>
      %124 = tpu.matmul %116, %123, %cst_47 {dimension_numbers = #tpu.dot_dimension_numbers<[1], [0], [0], [1], [0, 0, 1, 1], [], []>} : vector<1x51xf32>, vector<51x256xf32>, vector<1x256xf32> -> vector<1x256xf32>
      %125 = vector.extract_strided_slice %124 {offsets = [0, 128], sizes = [1, 51], strides = [1, 1]} : vector<1x256xf32> to vector<1x51xf32>
      %126 = vector.extract_strided_slice %124 {offsets = [0, 0], sizes = [1, 51], strides = [1, 1]} : vector<1x256xf32> to vector<1x51xf32>
      %127 = arith.divf %125, %126 : vector<1x51xf32>
      %cst_48 = arith.constant 2.000000e+00 : f32
      %128 = vector.broadcast %cst_48 : f32 to vector<1x51xf32>
      %129 = arith.mulf %127, %128 : vector<1x51xf32>
      %cst_49 = arith.constant 1.000000e+00 : f32
      %130 = vector.broadcast %cst_49 : f32 to vector<1x51xf32>
      %131 = arith.subf %129, %130 : vector<1x51xf32>
      %cst_50 = arith.constant -1.000000e+00 : f32
      %cst_51 = arith.constant 1.000000e+00 : f32
      %132 = vector.broadcast %cst_50 : f32 to vector<1x51xf32>
      %133 = arith.maximumf %132, %131 : vector<1x51xf32>
      %134 = vector.broadcast %cst_51 : f32 to vector<1x51xf32>
      %135 = arith.minimumf %134, %133 : vector<1x51xf32>
      %c0_52 = arith.constant 0 : index
      %c0_53 = arith.constant 0 : index
      %136 = vector.load %arg7[%c0_52, %c0_53] : memref<31x256xf32, #tpu.memory_space<vmem>>, vector<31x256xf32>
      %cst_54 = arith.constant dense<0.000000e+00> : vector<1x256xf32>
      %137 = tpu.matmul %122, %136, %cst_54 {dimension_numbers = #tpu.dot_dimension_numbers<[1], [0], [0], [1], [0, 0, 1, 1], [], []>} : vector<1x31xf32>, vector<31x256xf32>, vector<1x256xf32> -> vector<1x256xf32>
      %138 = vector.extract_strided_slice %137 {offsets = [0, 128], sizes = [1, 31], strides = [1, 1]} : vector<1x256xf32> to vector<1x31xf32>
      %139 = vector.extract_strided_slice %137 {offsets = [0, 0], sizes = [1, 31], strides = [1, 1]} : vector<1x256xf32> to vector<1x31xf32>
      %140 = arith.divf %138, %139 : vector<1x31xf32>
      %cst_55 = arith.constant 2.000000e+00 : f32
      %141 = vector.broadcast %cst_55 : f32 to vector<1x31xf32>
      %142 = arith.mulf %140, %141 : vector<1x31xf32>
      %cst_56 = arith.constant 1.000000e+00 : f32
      %143 = vector.broadcast %cst_56 : f32 to vector<1x31xf32>
      %144 = arith.subf %142, %143 : vector<1x31xf32>
      %cst_57 = arith.constant -1.000000e+00 : f32
      %cst_58 = arith.constant 1.000000e+00 : f32
      %145 = vector.broadcast %cst_57 : f32 to vector<1x31xf32>
      %146 = arith.maximumf %145, %144 : vector<1x31xf32>
      %147 = vector.broadcast %cst_58 : f32 to vector<1x31xf32>
      %148 = arith.minimumf %147, %146 : vector<1x31xf32>
      %c0_59 = arith.constant 0 : index
      %c0_60 = arith.constant 0 : index
      %149 = vector.load %arg8[%c0_59, %c0_60] : memref<51x32xf32, #tpu.memory_space<vmem>>, vector<51x32xf32>
      %cst_61 = arith.constant dense<0.000000e+00> : vector<1x32xf32>
      %150 = tpu.matmul %135, %149, %cst_61 {dimension_numbers = #tpu.dot_dimension_numbers<[1], [0], [0], [1], [0, 0, 1, 1], [], []>} : vector<1x51xf32>, vector<51x32xf32>, vector<1x32xf32> -> vector<1x32xf32>
      %c0_62 = arith.constant 0 : index
      %c0_63 = arith.constant 0 : index
      %151 = vector.load %arg12[%c0_62, %c0_63] : memref<1x32xf32, #tpu.memory_space<vmem>>, vector<1x32xf32>
      tpu.vector_store %arg12[%c0_62, %c0_63], %150 {strides = array<i32>} : memref<1x32xf32, #tpu.memory_space<vmem>>, vector<1x32xf32>,
      %c0_64 = arith.constant 0 : index
      %c0_65 = arith.constant 0 : index
      %152 = vector.load %arg13[%c0_64, %c0_65] : memref<1x31xf32, #tpu.memory_space<vmem>>, vector<1x31xf32>
      tpu.vector_store %arg13[%c0_64, %c0_65], %148 {strides = array<i32>} : memref<1x31xf32, #tpu.memory_space<vmem>>, vector<1x31xf32>,
    } else {
    }
    %c0 = arith.constant 0 : index
    %c0_1 = arith.constant 0 : index
    %3 = vector.load %arg10[%c0, %c0_1] : memref<16x31xf32, #tpu.memory_space<vmem>>, vector<16x31xf32>
    %c0_2 = arith.constant 0 : index
    %c0_3 = arith.constant 0 : index
    %4 = vector.load %arg13[%c0_2, %c0_3] : memref<1x31xf32, #tpu.memory_space<vmem>>, vector<1x31xf32>
    %5 = vector.broadcast %4 : vector<1x31xf32> to vector<16x31xf32>
    %6 = arith.mulf %3, %5 : vector<16x31xf32>
    %cst = arith.constant dense<0.000000e+00> : vector<16xf32>
    %7 = vector.multi_reduction <add>, %6, %cst [1] : vector<16x31xf32> to vector<16xf32>
    %8 = vector.shape_cast %7 : vector<16xf32> to vector<16x1xf32>
    %c0_4 = arith.constant 0 : index
    %c0_5 = arith.constant 0 : index
    %9 = vector.load %arg12[%c0_4, %c0_5] : memref<1x32xf32, #tpu.memory_space<vmem>>, vector<1x32xf32>
    %c0_6 = arith.constant 0 : index
    %c0_7 = arith.constant 0 : index
    %10 = vector.load %arg9[%c0_6, %c0_7] : memref<1x32xf32, #tpu.memory_space<vmem>>, vector<1x32xf32>
    %11 = vector.broadcast %8 : vector<16x1xf32> to vector<16x32xf32>
    %12 = vector.broadcast %10 : vector<1x32xf32> to vector<16x32xf32>
    %13 = arith.mulf %11, %12 : vector<16x32xf32>
    %14 = vector.broadcast %9 : vector<1x32xf32> to vector<16x32xf32>
    %15 = arith.addf %14, %13 : vector<16x32xf32>
    %c0_8 = arith.constant 0 : index
    %c0_9 = arith.constant 0 : index
    %c0_10 = arith.constant 0 : index
    %16 = vector.load %arg11[%c0_8, %c0_9, %c0_10] : memref<1x16x32xf32, #tpu.memory_space<vmem>>, vector<1x16x32xf32>
    %17 = vector.shape_cast %16 : vector<1x16x32xf32> to vector<16x32xf32>
    %18 = vector.shape_cast %15 : vector<16x32xf32> to vector<1x16x32xf32>
    tpu.vector_store %arg11[%c0_8, %c0_9, %c0_10], %18 {strides = array<i32>} : memref<1x16x32xf32, #tpu.memory_space<vmem>>, vector<1x16x32xf32>,
    return
  }
  func.func @transform_0(%arg0: i32, %arg1: i32) -> (i32, i32) {
    %c0_i32 = arith.constant 0 : i32
    %c0_i32_0 = arith.constant 0 : i32
    %c0_i32_1 = arith.constant 0 : i32
    return %c0_i32, %c0_i32_0 : i32, i32
  }
  func.func @transform_1(%arg0: i32, %arg1: i32) -> (i32, i32) {
    %c0_i32 = arith.constant 0 : i32
    %c0_i32_0 = arith.constant 0 : i32
    %c0_i32_1 = arith.constant 0 : i32
    return %c0_i32, %c0_i32_0 : i32, i32
  }
  func.func @transform_2(%arg0: i32, %arg1: i32) -> (i32, i32) {
    %c0_i32 = arith.constant 0 : i32
    %c0_i32_0 = arith.constant 0 : i32
    %c0_i32_1 = arith.constant 0 : i32
    return %c0_i32, %c0_i32_0 : i32, i32
  }
  func.func @transform_3(%arg0: i32, %arg1: i32) -> (i32, i32) {
    %c0_i32 = arith.constant 0 : i32
    %c0_i32_0 = arith.constant 0 : i32
    %c0_i32_1 = arith.constant 0 : i32
    return %c0_i32, %c0_i32_0 : i32, i32
  }
  func.func @transform_4(%arg0: i32, %arg1: i32) -> (i32, i32) {
    %c0_i32 = arith.constant 0 : i32
    %c0_i32_0 = arith.constant 0 : i32
    %c0_i32_1 = arith.constant 0 : i32
    return %c0_i32, %c0_i32_0 : i32, i32
  }
  func.func @transform_5(%arg0: i32, %arg1: i32) -> (i32, i32) {
    %c0_i32 = arith.constant 0 : i32
    %c0_i32_0 = arith.constant 0 : i32
    %c0_i32_1 = arith.constant 0 : i32
    return %c0_i32, %c0_i32_0 : i32, i32
  }
  func.func @transform_6(%arg0: i32, %arg1: i32) -> (i32, i32) {
    %c0_i32 = arith.constant 0 : i32
    %c0_i32_0 = arith.constant 0 : i32
    %c0_i32_1 = arith.constant 0 : i32
    return %c0_i32, %c0_i32_0 : i32, i32
  }
  func.func @transform_7(%arg0: i32, %arg1: i32) -> (i32, i32) {
    %c0_i32 = arith.constant 0 : i32
    %c0_i32_0 = arith.constant 0 : i32
    %c0_i32_1 = arith.constant 0 : i32
    return %c0_i32, %c0_i32_0 : i32, i32
  }
  func.func @transform_8(%arg0: i32, %arg1: i32) -> (i32, i32) {
    %c0_i32 = arith.constant 0 : i32
    %c0_i32_0 = arith.constant 0 : i32
    return %arg1, %c0_i32 : i32, i32
  }
  func.func @transform_9(%arg0: i32, %arg1: i32) -> (i32, i32, i32) {
    %c0_i32 = arith.constant 0 : i32
    %c0_i32_0 = arith.constant 0 : i32
    return %arg0, %arg1, %c0_i32 : i32, i32, i32
  }
}

</mosaic_0001>

<bundles_post_ra>
// kernel: tpu_custom_call.1
= control target key start
LH: loop header
LB: loop body
LE: loop exit
PB: predicated region body
PF: predicated region fallthrough
CT: control target
= control target key end

     0   :  { %14 = vsyncpa [#allocation5], 0  ;;  %s2403_s0 = inlined_call_operand.vmem [shape: f32[64,4], index: 0, kind: input, shape index: {}]   ;;  %s2404_s1 = inlined_call_operand.vmem [shape: f32[64,1], index: 1, kind: input, shape index: {}]   ;;  %s2405_s2 = inlined_call_operand.vmem [shape: f32[1,51], index: 2, kind: input, shape index: {}]   ;;  %s2406_s3 = inlined_call_operand.vmem [shape: f32[1,31], index: 3, kind: input, shape index: {}]   ;;  %s2407_s4 = inlined_call_operand.vmem [shape: f32[51,256], index: 4, kind: input, shape index: {}]   ;;  %s2408_s5 = inlined_call_operand.vmem [shape: f32[31,256], index: 5, kind: input, shape index: {}]   ;;  %s2409_s6 = inlined_call_operand.vmem [shape: f32[51,32], index: 6, kind: input, shape index: {}]   ;;  %s2410_s7 = inlined_call_operand.vmem [shape: f32[1,32], index: 7, kind: input, shape index: {}]   ;;  %s2411_s8 = inlined_call_operand.vmem [shape: f32[16,31], index: 8, kind: input, shape index: {}]   ;;  %s2412_s9 = inlined_call_operand.hbm [shape: f32[2,16,32], index: 9, kind: output, shape index: {}]  }
   0x1   :  { %16 = vsyncpa [#allocation5 + $0x1], 0  ;;  %s1831_s30 = smov 0   ;;  %s1833_s10 = smov 0  }
   0x2   :  { %s1835_s11 = smov 0   ;;  %s1837_s12 = smov 0  }
   0x3   :  { %s1839_s13 = smov 0   ;;  %s1841_s14 = smov 0  }
   0x4 LB: > { %s1477_s15 = sadd.s32 4294967295, %s1768_s14   ;;  %s1478_s16 = sadd.s32 4294967294, %s1768_s14   ;;  %s1768_s14 = sphi %s1841_s14, %s22_s14   ;;  %s1764_s13 = sphi %s1839_s13, %s2419_s13   ;;  %s1760_s12 = sphi %s1837_s12, %s2418_s12   ;;  %s1756_s11 = sphi %s1835_s11, %s2417_s11   ;;  %s1752_s10 = sphi %s1833_s10, %s2416_s10   ;;  %s1748_s30 = sphi %s1831_s30, %s2415_s30  }
   0x5   : > { %s34_s17 = sadd.s32 1, %s1764_s13  ;;  %s237_s18 = sadd.s32 1, %s1756_s11 }
   0x6   : > { %p36_p0 = scmp.ge.s32.totalorder %s34_s17, 2  ;;  %p247_p1 = scmp.ne.s32.totalorder %s1756_s11, %s1752_s10 }
   0x7   : > { %p248_p2 = scmp.eq.s32.totalorder %s1477_s15, 1  ;;  %p253_p3 = scmp.ne.s32.totalorder %s1752_s10, %s1748_s30 }
   0x8   : > { %s2421_s17 = smov (%p36_p0, %s34_s17), 0  ;;  %p254_p5 = scmp.eq.s32.totalorder %s1478_s16, 1 }
   0x9   : > { %p1871_p4 = por %p248_p2, %p247_p1  ;;  %s232_s20 = ssub.s32 %s1764_s13, %s2421_s17 }
   0xa   : > { %p1481_p6 = scmp.ge.s32.totalorder %s1768_s14, 1  ;;  %p235_p7 = scmp.eq.s32.totalorder %s232_s20, 0 }
   0xb   : > { %p1878_p8 = por %p254_p5, %p253_p3  ;;  %p305_p9 = scmp.lt.s32.totalorder %s1768_s14, 3 }
   0xc   : > { %s1884_s22 = scalar_select %p235_p7, %s1756_s11, %s237_s18  }
   0xd   : > { %p306_p10 = pnand %p1481_p6, %p305_p9 }
   0xe   : > { %s1770_s27 = smov (!%p306_p10), 2   ;;  %s1772_s15 = smov (!%p306_p10), 126  }
   0xf   : > { %309 = sbr.rel (%p306_p10) target bundleno = 1214 (0x4be), region = 56  ;;  %s338_s24 = sand.u32 (!%p306_p10), 1, %s1752_s10  }
  0x10   : > { %s1482_s25 = sshll.u32 (!%p306_p10), %s338_s24, 4  ;;  %s1505_s29 = sshll.u32 (!%p306_p10), %s1760_s12, 8 }
  0x11   : > { %s2354_s20 = scalar_lea.hbm (!%p306_p10), %s2412_s9, %s1505_s29  ;;  %s2358_s12 = scalar_lea.sflag (!%p306_p10), [#allocation5], %s338_s24 }
  0x14   : > { %v1889_v0 = vld [vmem:[%s2403_s0] sm:$0xff]  ;;  %v1894_v1 = vld [vmem:[%s2403_s0 + $0x10] sm:$0xff]  ;;  %v1901_v2 = vld [vmem:[%s2403_s0 + $0x8] sm:$0xff]  ;;  %v1771_v6 = vmov 2   ;;  %v1773_v47 = vmov 3   ;;  %v1774_v54 = vmov 0  }
  0x15   : > { %376 = vrot.lane.b32.xlu0 %v1889_v0, %s1770_s27  ;;  %380 = vrot.lane.b32.xlu1 %v1894_v1, %s1770_s27  ;;  %v1906_v3 = vld [vmem:[%s2403_s0 + $0x18] sm:$0xff]  ;;  %v1913_v4 = vld [vmem:[%s2403_s0 + $0x20] sm:$0xff]  ;;  %v1775_v62 = vmov 1   ;;  %vm742_vm0 = vcmask 416768   ;;  %vm767_vm1 = vcmask 252928   ;;  %vm824_vm2 = vcmask 7168  }
  0x16   : > { %v1918_v5 = vld [vmem:[%s2403_s0 + $0x28] sm:$0xff]  ;;  %1596 = vset.pattern.permute.xlu0 %v1771_v6  ;;  %1597 = vset.pattern.permute.xlu1 %v1771_v6  ;;  %v1927_v7 = vld [vmem:[%s2403_s0 + $0x30] sm:$0xff]  ;;  %v1932_v8 = vld [vmem:[%s2403_s0 + $0x38] sm:$0xff]  ;;  %vm1080_vm4 = vcmask 1042432   ;;  %vm1175_vm5 = vcmask 1046528   ;;  %vm1777_vm7 = vmmov 0  }
  0x17   : > { %vm1344_vm8 = vcmask 245760   ;;  %vm1342_vm9 = vcmask 253952   ;;  %vm1382_vm10 = vcmask 261120  }
  0x19   : > { %378 = vrot.lane.b32.xlu0 %v1901_v2, %s1770_s27  ;;  %382 = vrot.lane.b32.xlu1 %v1906_v3, %s1770_s27 }
  0x1d   : > { %384 = vrot.lane.b32.xlu0 %v1913_v4, %s1770_s27  ;;  %386 = vrot.lane.b32.xlu1 %v1918_v5, %s1770_s27 }
  0x21   : > { %388 = vrot.lane.b32.xlu0 %v1927_v7, %s1770_s27  ;;  %390 = vrot.lane.b32.xlu1 %v1932_v8, %s1770_s27 }
  0x87   : > { %v377_v9 = vpop.permute.xlu0 %376  ;;  %v381_v10 = vpop.permute.xlu1 %380 }
  0x88   : > { %v400_v11 = vsub.f32 %v1889_v0, %v377_v9  ;;  %v402_v12 = vsub.f32 %v1894_v1, %v381_v10 }
  0x8a   : > { %v408_v13 = vmul.f32 0.5, %v400_v11  ;;  %v456_v14 = vmul.f32 64.0, %v400_v11  ;;  %v410_v18 = vmul.f32 0.5, %v402_v12  ;;  %v458_v21 = vmul.f32 64.0, %v402_v12 }
  0x8b   : > { %v379_v15 = vpop.permute.xlu0 %378  ;;  %v383_v16 = vpop.permute.xlu1 %382 }
  0x8c   : > { %v464_v17 = vmax.f32 %v456_v14, 1.0  ;;  %v401_v19 = vsub.f32 %v1901_v2, %v379_v15  ;;  %424 = vrot.lane.b32.xlu0 %v408_v13, %s1772_s15  ;;  %v403_v20 = vsub.f32 %v1906_v3, %v383_v16  ;;  %v466_v30 = vmax.f32 %v458_v21, 1.0 }
  0x8e   : > { %1622 = vrcp.f32 %v464_v17  ;;  %v409_v22 = vmul.f32 0.5, %v401_v19  ;;  %v457_v23 = vmul.f32 64.0, %v401_v19  ;;  %v411_v27 = vmul.f32 0.5, %v403_v20 }
  0x8f   : > { %v385_v24 = vpop.permute.xlu0 %384  ;;  %v387_v25 = vpop.permute.xlu1 %386  ;;  %v459_v37 = vmul.f32 64.0, %v403_v20 }
  0x90   : > { %v465_v26 = vmax.f32 %v457_v23, 1.0  ;;  %v404_v28 = vsub.f32 %v1913_v4, %v385_v24  ;;  %428 = vrot.lane.b32.xlu0 %v410_v18, %s1772_s15  ;;  %426 = vrot.lane.b32.xlu1 %v409_v22, %s1772_s15  ;;  %v405_v29 = vsub.f32 %v1918_v5, %v387_v25  ;;  %v1993_v24 = vld [vmem:[%s2405_s2] ss:$0 sm:$0xff] }
  0x91   : > { %v467_v41 = vmax.f32 %v459_v37, 1.0 }
  0x92   : > { %1624 = vrcp.f32 %v465_v26  ;;  %v412_v31 = vmul.f32 0.5, %v404_v28  ;;  %v413_v34 = vmul.f32 0.5, %v405_v29  ;;  %v461_v39 = vmul.f32 64.0, %v405_v29  ;;  %v2001_v29 = vld [vmem:[%s2406_s3] ss:$0 sm:$0xff] }
  0x93   : > { %v389_v32 = vpop.permute.xlu0 %388  ;;  %v391_v33 = vpop.permute.xlu1 %390  ;;  %1626 = vrcp.f32 %v466_v30  ;;  %v460_v42 = vmul.f32 64.0, %v404_v28 }
  0x94   : > { %v406_v35 = vsub.f32 %v1927_v7, %v389_v32  ;;  %430 = vrot.lane.b32.xlu1 %v411_v27, %s1772_s15  ;;  %432 = vrot.lane.b32.xlu0 %v412_v31, %s1772_s15  ;;  %v407_v36 = vsub.f32 %v1932_v8, %v391_v33  ;;  %v469_v44 = vmax.f32 %v461_v39, 1.0  ;;  %1628 = vrcp.f32 %v467_v41 }
  0x95   : > { %v468_v45 = vmax.f32 %v460_v42, 1.0 }
  0x96   : > { %v414_v38 = vmul.f32 0.5, %v406_v35  ;;  %v415_v40 = vmul.f32 0.5, %v407_v36  ;;  %1630 = vrcp.f32 %v469_v44  ;;  %v462_v49 = vmul.f32 64.0, %v406_v35 }
  0x97   : > { %1632 = vrcp.f32 %v468_v45  ;;  %v463_v60 = vmul.f32 64.0, %v407_v36 }
  0x98   : > { %434 = vrot.lane.b32.xlu1 %v413_v34, %s1772_s15  ;;  %436 = vrot.lane.b32.xlu0 %v414_v38, %s1772_s15  ;;  %v470_v52 = vmax.f32 %v462_v49, 1.0 }
  0x99   : > { %v471_v10 = vmax.f32 %v463_v60, 1.0 }
  0x9a   : > { %1634 = vrcp.f32 %v470_v52 }
  0x9b   : > { %v1623_v43 = vpop.eup %1622  ;;  %1636 = vrcp.f32 %v471_v10 }
  0x9c   : > { %438 = vrot.lane.b32.xlu1 %v415_v40, %s1772_s15  ;;  %561 = vperm.xlu0 %1596, %v1623_v43   ;;  %s340_s15 = scalar_lea.vmem [#allocation4], %s1482_s25  ;;  %s1778_s25 = smov [#allocation4]  }
  0x9d   : > { %s1401_s27 = sshll.u32 %s340_s15, 4  ;;  %s1696_s26 = sshll.u32 %s1778_s25, 4  ;;  %s2356_s27 = int_to_ptr.vmem [resolvable:$true] %s1401_s27  ;;  %s1697_s26 = int_to_ptr.vmem [resolvable:$false] %s1696_s26 }
  0x9e   : > { %s1692_s23 = scalar_lea.vmem %s2356_s27, 256  ;;  %s1698_s28 = scalar_lea.vmem %s1697_s26, 512 }
  0x9f   : > { %v1625_v46 = vpop.eup %1624  ;;  %p1693_p11 = scmp.ne.s32.totalorder %s2356_s27, %s1692_s23  ;;  %p1699_p0 = scmp.lt.s32.totalorder %s2356_s27, %s1697_s26 }
  0xa0   : > { %566 = vperm.xlu1 %1597, %v1625_v46   ;;  %1598 = vset.pattern.permute.xlu0 %v1773_v47  ;;  %v1627_v48 = vpop.eup %1626  ;;  %p1700_p1 = scmp.lt.s32.totalorder %s1698_s28, %s1692_s23 }
  0xa1   : > { %687 = vperm.xlu0 %1598, %v1623_v43   ;;  %v1629_v50 = vpop.eup %1628  ;;  %p1694_p12 = pnand %p1693_p11, %p1871_p4 }
  0xa2   : > { %p1701_p2 = por %p1700_p1, %p1699_p0 }
  0xa3   : > { %v1631_v51 = vpop.eup %1630  ;;  %p1695_p13 = pneg %p1694_p12 }
  0xa4   : > { %1599 = vset.pattern.permute.xlu1 %v1773_v47  ;;  %v1633_v53 = vpop.eup %1632 }
  0xa5   : > { %691 = vperm.xlu1 %1599, %v1625_v46   ;;  %1600 = vset.pattern.permute.xlu0 %v1771_v6  ;;  %p1702_p3 = pnand %p1701_p2, %p1695_p13 }
  0xa6   : > { %571 = vperm.xlu0 %1600, %v1627_v48  }
  0xa7   : > { %v1635_v55 = vpop.eup %1634 }
  0xa9   : > { %695 = vperm.xlu1 %1599, %v1627_v48  }
  0xaa   : > { %1602 = vset.pattern.permute.xlu0 %v1773_v47 }
  0xab   : > { %699 = vperm.xlu0 %1602, %v1629_v50  }
  0xad   : > { %1601 = vset.pattern.permute.xlu1 %v1771_v6 }
  0xae   : > { %576 = vperm.xlu1 %1601, %v1629_v50  }
  0xaf   : > { %707 = vperm.xlu0 %1602, %v1631_v51  }
  0xb2   : > { %581 = vperm.xlu1 %1601, %v1633_v53  }
  0xb3   : > { %1605 = vset.pattern.permute.xlu0 %v1774_v54 }
  0xb6   : > { %1603 = vset.pattern.permute.xlu1 %v1773_v47 }
  0xb7   : > { %703 = vperm.xlu1 %1603, %v1633_v53  }
  0xbb   : > { %1604 = vset.pattern.permute.xlu1 %v1771_v6 }
  0xbc   : > { %586 = vperm.xlu1 %1604, %v1631_v51  }
  0xc0   : > { %591 = vperm.xlu1 %1604, %v1635_v55  }
  0xc4   : > { %1606 = vset.pattern.permute.xlu1 %v1774_v54 }
  0xfe   : > { %v425_v56 = vpop.permute.xlu0 %424 }
  0xff   : > { %v448_v57 = vadd.f32 %v425_v56, %v1889_v0 }
 0x101   : > { %497 = vperm.xlu0 %1605, %v448_v57  }
 0x102   : > { %v427_v58 = vpop.permute.xlu1 %426  ;;  %v429_v59 = vpop.permute.xlu0 %428 }
 0x103   : > { %v449_v61 = vadd.f32 %v427_v58, %v1901_v2  ;;  %v450_v13 = vadd.f32 %v429_v59, %v1894_v1 }
 0x105   : > { %502 = vperm.xlu1 %1606, %v449_v61   ;;  %1608 = vset.pattern.permute.xlu0 %v1775_v62 }
 0x106   : > { %635 = vperm.xlu0 %1608, %v449_v61   ;;  %v431_v63 = vpop.permute.xlu1 %430  ;;  %v433_v9 = vpop.permute.xlu0 %432 }
 0x107   : > { %v451_v11 = vadd.f32 %v431_v63, %v1906_v3  ;;  %v1637_v3 = vpop.eup %1636  ;;  %v452_v1 = vadd.f32 %v433_v9, %v1913_v4 }
 0x109   : > { %1607 = vset.pattern.permute.xlu1 %v1775_v62 }
 0x10a   : > { %631 = vperm.xlu1 %1607, %v448_v57   ;;  %1611 = vset.pattern.permute.xlu0 %v1774_v54  ;;  %v437_v0 = vpop.permute.xlu0 %436  ;;  %v435_v12 = vpop.permute.xlu1 %434 }
 0x10b   : > { %512 = vperm.xlu0 %1611, %v451_v11   ;;  %v454_v2 = vadd.f32 %v437_v0, %v1927_v7  ;;  %v453_v7 = vadd.f32 %v435_v12, %v1918_v5 }
 0x10e   : > { %1609 = vset.pattern.permute.xlu1 %v1774_v54  ;;  %v439_v14 = vpop.permute.xlu1 %438 }
 0x10f   : > { %507 = vperm.xlu1 %1609, %v450_v13   ;;  %527 = vperm.xlu0 %1611, %v454_v2   ;;  %v455_v15 = vadd.f32 %v439_v14, %v1932_v8 }
 0x113   : > { %1610 = vset.pattern.permute.xlu1 %v1775_v62  ;;  %1618 = vset.pattern.permute.xlu0 %v1775_v62 }
 0x114   : > { %639 = vperm.xlu1 %1610, %v450_v13   ;;  %659 = vperm.xlu0 %1618, %v455_v15  }
 0x117   : > { %v562_v5 = vpop.permute.xlu0 %561 }
 0x118   : > { %643 = vperm.xlu1 %1610, %v451_v11   ;;  %1619 = vset.pattern.permute.xlu0 %v1771_v6 }
 0x119   : > { %596 = vperm.xlu0 %1619, %v1637_v3  }
 0x11b   : > { %v567_v4 = vpop.permute.xlu1 %566 }
 0x11c   : > { %1612 = vset.pattern.permute.xlu1 %v1774_v54  ;;  %v688_v17 = vpop.permute.xlu0 %687 }
 0x11d   : > { %517 = vperm.xlu1 %1612, %v452_v1   ;;  %1620 = vset.pattern.permute.xlu0 %v1774_v54 }
 0x120   : > { %v692_v6 = vpop.permute.xlu1 %691 }
 0x121   : > { %1613 = vset.pattern.permute.xlu1 %v1775_v62  ;;  %v572_v19 = vpop.permute.xlu0 %571 }
 0x122   : > { %647 = vperm.xlu1 %1613, %v452_v1  }
 0x124   : > { %v1978_v8 = vpop.permute.xlu1 %695 }
 0x126   : > { %1614 = vset.pattern.permute.xlu1 %v1774_v54  ;;  %v1982_v20 = vpop.permute.xlu0 %699 }
 0x127   : > { %522 = vperm.xlu1 %1614, %v453_v7  }
 0x129   : > { %v577_v16 = vpop.permute.xlu1 %576 }
 0x12a   : > { %v1988_v23 = vpop.permute.xlu0 %707 }
 0x12b   : > { %1615 = vset.pattern.permute.xlu1 %v1775_v62 }
 0x12c   : > { %651 = vperm.xlu1 %1615, %v453_v7  }
 0x12d   : > { %v1980_v18 = vpop.permute.xlu1 %581 }
 0x130   : > { %655 = vperm.xlu1 %1615, %v454_v2  }
 0x132   : > { %v1984_v21 = vpop.permute.xlu1 %703 }
 0x134   : > { %1616 = vset.pattern.permute.xlu1 %v1774_v54 }
 0x135   : > { %532 = vperm.xlu1 %1616, %v455_v15  }
 0x137   : > { %v1986_v22 = vpop.permute.xlu1 %586 }
 0x139   : > { %1617 = vset.pattern.permute.xlu1 %v1773_v47 }
 0x13a   : > { %711 = vperm.xlu1 %1617, %v1635_v55  }
 0x13b   : > { %v1995_v25 = vpop.permute.xlu1 %591 }
 0x13e   : > { %715 = vperm.xlu1 %1617, %v1637_v3  }
 0x142   : > { %1621 = vset.pattern.permute.xlu1 %v1774_v54 }
 0x17c   : > { %v498_v26 = vpop.permute.xlu0 %497 }
 0x17d   : > { %v535_v27 = vsub.f32 %v1993_v24, %v498_v26 }
 0x17f   : > { %v543_v28 = vmul.f32 %v535_v27, %v535_v27 }
 0x180   : > { %v503_v30 = vpop.permute.xlu1 %502 }
 0x181   : > { %v551_v31 = vmul.f32 -0.5, %v543_v28  ;;  %v536_v32 = vsub.f32 %v1993_v24, %v503_v30  ;;  %v636_v33 = vpop.permute.xlu0 %635 }
 0x182   : > { %v663_v34 = vsub.f32 %v2001_v29, %v636_v33 }
 0x183   : > { %v599_v35 = vmul.f32 %v562_v5, %v551_v31  ;;  %v544_v36 = vmul.f32 %v536_v32, %v536_v32 }
 0x184   : > { %v671_v37 = vmul.f32 %v663_v34, %v663_v34 }
 0x185   : > { %v607_v38 = vmul.f32 1.442695, %v599_v35  ;;  %v552_v39 = vmul.f32 -0.5, %v544_v36  ;;  %v632_v40 = vpop.permute.xlu1 %631 }
 0x186   : > { %v679_v41 = vmul.f32 -0.5, %v671_v37  ;;  %v662_v42 = vsub.f32 %v2001_v29, %v632_v40  ;;  %v513_v43 = vpop.permute.xlu0 %512 }
 0x187   : > { %1638 = vpow2.f32 %v607_v38  ;;  %v600_v44 = vmul.f32 %v567_v4, %v552_v39  ;;  %v538_v45 = vsub.f32 %v1993_v24, %v513_v43 }
 0x188   : > { %v719_v46 = vmul.f32 %v692_v6, %v679_v41  ;;  %v670_v47 = vmul.f32 %v662_v42, %v662_v42 }
 0x189   : > { %v609_v48 = vmul.f32 1.442695, %v600_v44  ;;  %v546_v49 = vmul.f32 %v538_v45, %v538_v45 }
 0x18a   : > { %v728_v50 = vmul.f32 1.442695, %v719_v46  ;;  %v678_v51 = vmul.f32 -0.5, %v670_v47  ;;  %v508_v52 = vpop.permute.xlu1 %507  ;;  %v528_v7 = vpop.permute.xlu0 %527 }
 0x18b   : > { %1640 = vpow2.f32 %v609_v48  ;;  %v554_v53 = vmul.f32 -0.5, %v546_v49  ;;  %v537_v55 = vsub.f32 %v1993_v24, %v508_v52  ;;  %v541_v27 = vsub.f32 %v1993_v24, %v528_v7 }
 0x18c   : > { %1642 = vpow2.f32 %v728_v50  ;;  %v718_v56 = vmul.f32 %v688_v17, %v678_v51 }
 0x18d   : > { %v545_v57 = vmul.f32 %v537_v55, %v537_v55  ;;  %v602_v59 = vmul.f32 %v577_v16, %v554_v53 }
 0x18e   : > { %v726_v58 = vmul.f32 1.442695, %v718_v56 }
 0x18f   : > { %v553_v60 = vmul.f32 -0.5, %v545_v57  ;;  %v640_v61 = vpop.permute.xlu1 %639  ;;  %v613_v10 = vmul.f32 1.442695, %v602_v59 }
 0x190   : > { %1644 = vpow2.f32 %v726_v58  ;;  %v664_v62 = vsub.f32 %v2001_v29, %v640_v61 }
 0x191   : > { %v601_v63 = vmul.f32 %v572_v19, %v553_v60 }
 0x192   : > { %v672_v9 = vmul.f32 %v664_v62, %v664_v62 }
 0x193   : > { %v611_v11 = vmul.f32 1.442695, %v601_v63  ;;  %v644_v0 = vpop.permute.xlu1 %643 }
 0x194   : > { %v2009_v12 = vpop.eup %1638  ;;  %v680_v13 = vmul.f32 -0.5, %v672_v9  ;;  %v665_v2 = vsub.f32 %v2001_v29, %v644_v0  ;;  %v660_v9 = vpop.permute.xlu0 %659 }
 0x195   : > { %1646 = vpow2.f32 %v611_v11  ;;  %v743_v14 = vsel %vm742_vm0, %v2009_v12, 0.0 }
 0x196   : > { %v720_v15 = vmul.f32 %v1978_v8, %v680_v13  ;;  %v673_v3 = vmul.f32 %v665_v2, %v665_v2  ;;  %744 = vadd.xlane.f32.xlu1 %v743_v14  ;;  %1648 = vpow2.f32 %v613_v10  ;;  %v669_v10 = vsub.f32 %v2001_v29, %v660_v9 }
 0x198   : > { %v2015_v1 = vpop.eup %1640  ;;  %v730_v4 = vmul.f32 1.442695, %v720_v15  ;;  %v681_v6 = vmul.f32 -0.5, %v673_v3  ;;  %v518_v5 = vpop.permute.xlu1 %517  ;;  %v677_v3 = vmul.f32 %v669_v10, %v669_v10 }
 0x199   : > { %v2017_v16 = vpop.eup %1642  ;;  %v539_v17 = vsub.f32 %v1993_v24, %v518_v5  ;;  %v746_v19 = vsel %vm742_vm0, %v2015_v1, 0.0  ;;  %v597_v5 = vpop.permute.xlu0 %596 }
 0x19a   : > { %1650 = vpow2.f32 %v730_v4  ;;  %v721_v8 = vmul.f32 %v1982_v20, %v681_v6  ;;  %747 = vadd.xlane.f32.xlu0 %v746_v19  ;;  %v771_v26 = vsel %vm767_vm1, %v2017_v16, 0.0  ;;  %v549_v20 = vmul.f32 %v541_v27, %v541_v27 }
 0x19b   : > { %v547_v28 = vmul.f32 %v539_v17, %v539_v17  ;;  %772 = vadd.xlane.f32.xlu1 %v771_v26 }
 0x19c   : > { %v732_v30 = vmul.f32 1.442695, %v721_v8  ;;  %v557_v42 = vmul.f32 -0.5, %v549_v20 }
 0x19d   : > { %v2026_v31 = vpop.eup %1644  ;;  %v555_v32 = vmul.f32 -0.5, %v547_v28  ;;  %v648_v33 = vpop.permute.xlu1 %647 }
 0x19e   : > { %1652 = vpow2.f32 %v732_v30  ;;  %v666_v34 = vsub.f32 %v2001_v29, %v648_v33  ;;  %v768_v35 = vsel %vm767_vm1, %v2026_v31, 0.0  ;;  %v605_v49 = vmul.f32 %v1995_v25, %v557_v42 }
 0x19f   : > { %v603_v36 = vmul.f32 %v1980_v18, %v555_v32  ;;  %769 = vadd.xlane.f32.xlu0 %v768_v35 }
 0x1a0   : > { %v674_v37 = vmul.f32 %v666_v34, %v666_v34  ;;  %v619_v58 = vmul.f32 1.442695, %v605_v49 }
 0x1a1   : > { %v615_v38 = vmul.f32 1.442695, %v603_v36 }
 0x1a2   : > { %v2032_v39 = vpop.eup %1646  ;;  %v682_v40 = vmul.f32 -0.5, %v674_v37  ;;  %v523_v41 = vpop.permute.xlu1 %522 }
 0x1a3   : > { %1654 = vpow2.f32 %v615_v38  ;;  %v540_v43 = vsub.f32 %v1993_v24, %v523_v41  ;;  %v749_v44 = vsel %vm742_vm0, %v2032_v39, 0.0  ;;  %v2037_v45 = vpop.eup %1648 }
 0x1a4   : > { %v722_v46 = vmul.f32 %v1984_v21, %v682_v40  ;;  %750 = vadd.xlane.f32.xlu0 %v749_v44  ;;  %v752_v52 = vsel %vm742_vm0, %v2037_v45, 0.0 }
 0x1a5   : > { %v548_v18 = vmul.f32 %v540_v43, %v540_v43 }
 0x1a6   : > { %v734_v47 = vmul.f32 1.442695, %v722_v46 }
 0x1a7   : > { %v2040_v48 = vpop.eup %1650  ;;  %v556_v50 = vmul.f32 -0.5, %v548_v18  ;;  %v652_v51 = vpop.permute.xlu1 %651 }
 0x1a8   : > { %1656 = vpow2.f32 %v734_v47  ;;  %v667_v53 = vsub.f32 %v2001_v29, %v652_v51  ;;  %753 = vadd.xlane.f32.xlu0 %v752_v52  ;;  %v774_v55 = vsel %vm767_vm1, %v2040_v48, 0.0 }
 0x1a9   : > { %v604_v21 = vmul.f32 %v1986_v22, %v556_v50  ;;  %775 = vadd.xlane.f32.xlu1 %v774_v55 }
 0x1aa   : > { %v675_v56 = vmul.f32 %v667_v53, %v667_v53 }
 0x1ab   : > { %v2049_v57 = vpop.eup %1652  ;;  %v617_v25 = vmul.f32 1.442695, %v604_v21  ;;  %v656_v59 = vpop.permute.xlu1 %655 }
 0x1ac   : > { %v683_v60 = vmul.f32 -0.5, %v675_v56  ;;  %v668_v61 = vsub.f32 %v2001_v29, %v656_v59  ;;  %v777_v62 = vsel %vm767_vm1, %v2049_v57, 0.0  ;;  %v361_v56 = vld [vmem:[%s2404_s1 + $0x8] sm:$0xff] }
 0x1ad   : > { %1658 = vpow2.f32 %v617_v25  ;;  %778 = vadd.xlane.f32.xlu1 %v777_v62 }
 0x1ae   : > { %v723_v63 = vmul.f32 %v1988_v23, %v683_v60  ;;  %1660 = vpow2.f32 %v619_v58  ;;  %v676_v0 = vmul.f32 %v668_v61, %v668_v61  ;;  %v360_v58 = vld [vmem:[%s2404_s1] sm:$0xff]  ;;  %v826_v60 = vsel %vm824_vm2, %v361_v56, 0.0 }
 0x1af   : > { %v825_v61 = vsel %vm824_vm2, %v360_v58, 0.0 }
 0x1b0   : > { %v2055_v22 = vpop.eup %1654  ;;  %v736_v11 = vmul.f32 1.442695, %v723_v63  ;;  %v533_v13 = vpop.permute.xlu1 %532  ;;  %v684_v7 = vmul.f32 -0.5, %v676_v0  ;;  %v827_v0 = vadd.f32 %v826_v60, %v825_v61 }
 0x1b1   : > { %v542_v2 = vsub.f32 %v1993_v24, %v533_v13  ;;  %v755_v14 = vsel %vm742_vm0, %v2055_v22, 0.0  ;;  %v685_v24 = vmul.f32 -0.5, %v677_v3  ;;  %v362_v13 = vld [vmem:[%s2404_s1 + $0x10] sm:$0xff] }
 0x1b2   : > { %1662 = vpow2.f32 %v736_v11  ;;  %756 = vadd.xlane.f32.xlu0 %v755_v14 }
 0x1b3   : > { %v550_v15 = vmul.f32 %v542_v2, %v542_v2 }
 0x1b5   : > { %v2061_v23 = vpop.eup %1656  ;;  %v558_v4 = vmul.f32 -0.5, %v550_v15  ;;  %v712_v6 = vpop.permute.xlu1 %711  ;;  %v828_v15 = vsel %vm824_vm2, %v362_v13, 0.0 }
 0x1b6   : > { %v724_v17 = vmul.f32 %v712_v6, %v684_v7  ;;  %v780_v29 = vsel %vm767_vm1, %v2061_v23, 0.0  ;;  %v363_v6 = vld [vmem:[%s2404_s1 + $0x18] sm:$0xff] }
 0x1b7   : > { %v606_v19 = vmul.f32 %v597_v5, %v558_v4  ;;  %781 = vadd.xlane.f32.xlu1 %v780_v29  ;;  %v829_v4 = vadd.f32 %v828_v15, %v827_v0  ;;  %v830_v5 = vsel %vm824_vm2, %v363_v6, 0.0 }
 0x1b8   : > { %v738_v8 = vmul.f32 1.442695, %v724_v17 }
 0x1b9   : > { %v621_v26 = vmul.f32 1.442695, %v606_v19  ;;  %v716_v27 = vpop.permute.xlu1 %715  ;;  %v831_v19 = vadd.f32 %v830_v5, %v829_v4 }
 0x1ba   : > { %v2065_v28 = vpop.eup %1658  ;;  %1664 = vpow2.f32 %v738_v8  ;;  %v725_v30 = vmul.f32 %v716_v27, %v685_v24  ;;  %v364_v24 = vld [vmem:[%s2404_s1 + $0x20] sm:$0xff] }
 0x1bb   : > { %1666 = vpow2.f32 %v621_v26  ;;  %v758_v32 = vsel %vm742_vm0, %v2065_v28, 0.0  ;;  %v2069_v33 = vpop.eup %1660  ;;  %v832_v26 = vsel %vm824_vm2, %v364_v24, 0.0 }
 0x1bc   : > { %v740_v34 = vmul.f32 1.442695, %v725_v30  ;;  %759 = vadd.xlane.f32.xlu0 %v758_v32  ;;  %v761_v20 = vsel %vm742_vm0, %v2069_v33, 0.0  ;;  %v365_v30 = vld [vmem:[%s2404_s1 + $0x28] sm:$0xff] }
 0x1be   : > { %1668 = vpow2.f32 %v740_v34 }
 0x1bf   : > { %v2071_v35 = vpop.eup %1662 }
 0x1c0   : > { %762 = vadd.xlane.f32.xlu0 %v761_v20  ;;  %v783_v36 = vsel %vm767_vm1, %v2071_v35, 0.0  ;;  %v833_v20 = vadd.f32 %v832_v26, %v831_v19 }
 0x1c1   : > { %784 = vadd.xlane.f32.xlu1 %v783_v36  ;;  %v834_v36 = vsel %vm824_vm2, %v365_v30, 0.0 }
 0x1c7   : > { %v2077_v37 = vpop.eup %1664 }
 0x1c8   : > { %v2079_v38 = vpop.eup %1666  ;;  %v786_v40 = vsel %vm767_vm1, %v2077_v37, 0.0 }
 0x1c9   : > { %787 = vadd.xlane.f32.xlu1 %v786_v40  ;;  %v764_v41 = vsel %vm742_vm0, %v2079_v38, 0.0 }
 0x1ca   : > { %765 = vadd.xlane.f32.xlu0 %v764_v41  ;;  %v366_v41 = vld [vmem:[%s2404_s1 + $0x30] sm:$0xff] }
 0x1cb   : > { %v2085_v42 = vpop.eup %1668 }
 0x1cc   : > { %v789_v43 = vsel %vm767_vm1, %v2085_v42, 0.0 }
 0x1cd   : > { %790 = vadd.xlane.f32.xlu1 %v789_v43 }
 0x21f   : > { %v2089_v44 = vpop.xlane.xlu1 %744 }
 0x223   : > { %v2091_v46 = vpop.xlane.xlu0 %747 }
 0x224   : > { %v2093_v18 = vpop.xlane.xlu1 %772 }
 0x225   : > { %v793_v47 = vmul.f32 %v2093_v18, %v2091_v46 }
 0x227   : > { %v801_v49 = vadd.f32 1e-05, %v793_v47 }
 0x228   : > { %v2097_v50 = vpop.xlane.xlu0 %769 }
 0x229   : > { %1670 = vrcp.f32 %v801_v49  ;;  %v792_v51 = vmul.f32 %v2097_v50, %v2089_v44  ;;  %v835_v49 = vadd.f32 %v834_v36, %v833_v20 }
 0x22b   : > { %v800_v52 = vadd.f32 1e-05, %v792_v51 }
 0x22d   : > { %1672 = vrcp.f32 %v800_v52  ;;  %v2101_v53 = vpop.xlane.xlu0 %750 }
 0x231   : > { %v2115_v62 = vpop.xlane.xlu0 %753 }
 0x232   : > { %v2103_v55 = vpop.xlane.xlu1 %775 }
 0x233   : > { %v794_v21 = vmul.f32 %v2103_v55, %v2101_v53 }
 0x235   : > { %v802_v25 = vadd.f32 1e-05, %v794_v21  ;;  %v836_v21 = vsel %vm824_vm2, %v366_v41, 0.0 }
 0x236   : > { %v1671_v59 = vpop.eup %1670  ;;  %v2117_v63 = vpop.xlane.xlu1 %778  ;;  %v837_v60 = vadd.f32 %v836_v21, %v835_v49 }
 0x237   : > { %v2119_v9 = vmul.f32 %v1671_v59, %v361_v56  ;;  %1674 = vrcp.f32 %v802_v25  ;;  %v795_v10 = vmul.f32 %v2117_v63, %v2115_v62  ;;  %v367_v25 = vld [vmem:[%s2404_s1 + $0x38] sm:$0xff] }
 0x238   : > { %v838_v61 = vsel %vm824_vm2, %v367_v25, 0.0 }
 0x239   : > { %v847_v11 = vmul.f32 %v2119_v9, %v2093_v18  ;;  %v803_v2 = vadd.f32 1e-05, %v795_v10  ;;  %v839_v10 = vadd.f32 %v838_v61, %v837_v60 }
 0x23a   : > { %v1673_v14 = vpop.eup %1672 }
 0x23b   : > { %v809_v3 = vmul.f32 %v1673_v14, %v360_v58  ;;  %1676 = vrcp.f32 %v803_v2  ;;  %861 = vperm.xlu1 %1621, %v847_v11   ;;  %v757_v17 = vpop.xlane.xlu0 %756  ;;  %v840_v4 = vrot.slane %v839_v10, 4 }
 0x23d   : > { %v846_v7 = vmul.f32 %v809_v3, %v2097_v50  ;;  %v841_v26 = vadd.f32 %v840_v4, %v839_v10 }
 0x23f   : > { %856 = vperm.xlu0 %1620, %v846_v7   ;;  %v842_v49 = vrot.slane %v841_v26, 2 }
 0x240   : > { %v2134_v29 = vpop.xlane.xlu1 %781 }
 0x241   : > { %v796_v8 = vmul.f32 %v2134_v29, %v757_v17 }
 0x243   : > { %v804_v27 = vadd.f32 1e-05, %v796_v8  ;;  %v2157_v8 = vmul.f32 %v809_v3, %v2089_v44 }
 0x244   : > { %v1675_v32 = vpop.eup %1674 }
 0x245   : > { %v813_v34 = vmul.f32 %v1675_v32, %v362_v13  ;;  %1678 = vrcp.f32 %v804_v27  ;;  %v760_v51 = vpop.xlane.xlu0 %759  ;;  %v924_v32 = vmul.f32 %v2119_v9, %v2091_v46  ;;  %v1000_v36 = vmul.f32 %v2157_v8, %v2097_v50 }
 0x247   : > { %v848_v40 = vmul.f32 %v813_v34, %v2103_v55  ;;  %v1001_v44 = vmul.f32 %v924_v32, %v2093_v18 }
 0x248   : > { %v1677_v43 = vpop.eup %1676 }
 0x249   : > { %v815_v47 = vmul.f32 %v1677_v43, %v363_v6  ;;  %866 = vperm.xlu1 %1621, %v848_v40   ;;  %v763_v0 = vpop.xlane.xlu0 %762  ;;  %v1009_v50 = vsel %vm824_vm2, %v1001_v44, 0.0 }
 0x24a   : > { %v785_v52 = vpop.xlane.xlu1 %784 }
 0x24b   : > { %v849_v56 = vmul.f32 %v815_v47, %v2117_v63  ;;  %v797_v58 = vmul.f32 %v785_v52, %v760_v51  ;;  %v926_v40 = vmul.f32 %v815_v47, %v2115_v62 }
 0x24d   : > { %v805_v59 = vadd.f32 1e-05, %v797_v58  ;;  %871 = vperm.xlu1 %1621, %v849_v56   ;;  %v1003_v9 = vmul.f32 %v926_v40, %v2117_v63  ;;  %v843_v56 = vadd.f32 %v842_v49, %v841_v26 }
 0x24f   : > { %1680 = vrcp.f32 %v805_v59  ;;  %v844_v59 = vrot.slane %v843_v56, 1 }
 0x252   : > { %v1679_v11 = vpop.eup %1678  ;;  %v788_v13 = vpop.xlane.xlu1 %787 }
 0x253   : > { %v817_v2 = vmul.f32 %v1679_v11, %v364_v24  ;;  %v798_v14 = vmul.f32 %v788_v13, %v763_v0  ;;  %v766_v6 = vpop.xlane.xlu0 %765  ;;  %v2162_v24 = vmul.f32 %v813_v34, %v2101_v53  ;;  %v1008_v53 = vsel %vm824_vm2, %v1000_v36, 0.0 }
 0x254   : > { %v1010_v47 = vadd.f32 %v1009_v50, %v1008_v53  ;;  %v1076_v53 = vld [vmem:[%s2407_s4 + $0x68] sm:$0x7]  ;;  %v1070_v50 = vld [vmem:[%s2407_s4 + $0x38] sm:$0xff] }
 0x255   : > { %v850_v15 = vmul.f32 %v817_v2, %v2134_v29  ;;  %v806_v7 = vadd.f32 1e-05, %v798_v14  ;;  %v1002_v3 = vmul.f32 %v2162_v24, %v2103_v55  ;;  %v2170_v21 = vmul.f32 %v817_v2, %v757_v17  ;;  %1485 = vmatprep.subr.msk.mxu0 %vm1080_vm4, %v1076_v53 }
 0x256   : > { %v791_v5 = vpop.xlane.xlu1 %790  ;;  %v1013_v55 = vsel %vm824_vm2, %v1003_v9, 0.0 }
 0x257   : > { %1682 = vrcp.f32 %v806_v7  ;;  %v799_v19 = vmul.f32 %v791_v5, %v766_v6  ;;  %876 = vperm.xlu1 %1621, %v850_v15   ;;  %v1011_v62 = vsel %vm824_vm2, %v1002_v3, 0.0  ;;  %v1004_v18 = vmul.f32 %v2170_v21, %v2134_v29 }
 0x258   : > { %v1012_v60 = vadd.f32 %v1011_v62, %v1010_v47  ;;  %v2184_v15 = vadd.f32 %v844_v59, %v843_v56  ;;  %v1072_v56 = vld [vmem:[%s2407_s4 + $0x48] sm:$0xff]  ;;  %v1069_v62 = vld [vmem:[%s2407_s4 + $0x30] sm:$0xff]  ;;  %v1066_v47 = vld [vmem:[%s2407_s4 + $0x18] sm:$0xff]  ;;  %v1776_v59 = vmov 0.0  }
 0x259   : > { %v807_v27 = vadd.f32 1e-05, %v799_v19  ;;  %v1015_v63 = vsel %vm824_vm2, %v1004_v18, 0.0  ;;  %v1068_v18 = vld [vmem:[%s2407_s4 + $0x28] sm:$0xff]  ;;  %1151 = vmatprep.mubr.f32.mxu0 %v1776_v59  ;;  %1246 = vmatprep.mubr.f32.mxu1 %v1776_v59 }
 0x25a   : > { %v1014_v11 = vadd.f32 %v1013_v55, %v1012_v60  ;;  %vm1045_vm3 = vcmp.gt.f32.partialorder %v2184_v15, 0.0  ;;  %v1043_v44 = vmul.f32 0.42488578, %v2184_v15  ;;  %v1065_v55 = vld [vmem:[%s2407_s4 + $0x10] sm:$0xff] }
 0x25b   : > { %1684 = vrcp.f32 %v807_v27  ;;  %v1055_v36 = vsel %vm1045_vm3, 1, %v1774_v54  ;;  %v1075_v54 = vld [vmem:[%s2407_s4 + $0x60] sm:$0x7] }
 0x25c   : > { %v1681_v20 = vpop.eup %1680  ;;  %v1016_v7 = vadd.f32 %v1015_v63, %v1014_v11  ;;  %1486 = vmatpush1.msk.msra.mxu0 %vm1080_vm4, %v1075_v54  ;;  %v1036_v63 = vmul.f32 0.013705993, %v2184_v15  ;;  %v1165_v11 = vld [vmem:[%s2408_s5 + $0x8] sm:$0xff] }
 0x25d   : > { %v819_v43 = vmul.f32 %v1681_v20, %v365_v30 }
 0x25f   : > { %v851_v46 = vmul.f32 %v819_v43, %v785_v52  ;;  %v928_v34 = vmul.f32 %v819_v43, %v760_v51 }
 0x261   : > { %881 = vperm.xlu1 %1621, %v851_v46   ;;  %v1005_v17 = vmul.f32 %v928_v34, %v785_v52 }
 0x263   : > { %v1017_v2 = vsel %vm824_vm2, %v1005_v17, 0.0  ;;  %v1064_v17 = vld [vmem:[%s2407_s4 + $0x8] sm:$0xff] }
 0x264   : > { %v1683_v30 = vpop.eup %1682  ;;  %v1018_v19 = vadd.f32 %v1017_v2, %v1016_v7  ;;  %v1164_v2 = vld [vmem:[%s2408_s5] sm:$0xff] }
 0x265   : > { %v821_v58 = vmul.f32 %v1683_v30, %v366_v41  ;;  %v1067_v30 = vld [vmem:[%s2407_s4 + $0x20] sm:$0xff] }
 0x267   : > { %v852_v51 = vmul.f32 %v821_v58, %v788_v13  ;;  %v2180_v61 = vmul.f32 %v821_v58, %v763_v0  ;;  %v1029_v0 = vmul.f32 0.008331094, %v2184_v15  ;;  %v1063_v58 = vld [vmem:[%s2407_s4] sm:$0xff] }
 0x268   : > { %v1685_v10 = vpop.eup %1684 }
 0x269   : > { %v1006_v14 = vmul.f32 %v2180_v61, %v788_v13  ;;  %v823_v29 = vmul.f32 %v1685_v10, %v367_v25  ;;  %886 = vperm.xlu1 %1621, %v852_v51   ;;  %v1171_v51 = vld [vmem:[%s2408_s5 + $0x38] sm:$0x7f]  ;;  %v1170_v10 = vld [vmem:[%s2408_s5 + $0x30] sm:$0x7f] }
 0x26a   : > { %1490 = vmatprep.subr.msk.mxu1 %vm1175_vm5, %v1171_v51 }
 0x26b   : > { %v1019_v41 = vsel %vm824_vm2, %v1006_v14, 0.0  ;;  %v853_v52 = vmul.f32 %v823_v29, %v791_v5  ;;  %v930_v4 = vmul.f32 %v823_v29, %v766_v6  ;;  %1491 = vmatpush1.msk.msra.mxu1 %vm1175_vm5, %v1170_v10 }
 0x26c   : > { %v1020_v27 = vadd.f32 %v1019_v41, %v1018_v19 }
 0x26d   : > { %v1007_v26 = vmul.f32 %v930_v4, %v791_v5  ;;  %891 = vperm.xlu1 %1621, %v853_v52  }
 0x26f   : > { %v1021_v20 = vsel %vm824_vm2, %v1007_v26, 0.0 }
 0x270   : > { %v1022_v13 = vadd.f32 %v1021_v20, %v1020_v27 }
 0x271   : > { %1032 = vperm.xlu1 %1621, %v1029_v0  }
 0x272   : > { %v1023_v25 = vrot.slane %v1022_v13, 4 }
 0x274   : > { %v1024_v43 = vadd.f32 %v1023_v25, %v1022_v13 }
 0x275   : > { %1057 = vperm.xlu1 %1621, %v1055_v36  }
 0x276   : > { %v1025_v6 = vrot.slane %v1024_v43, 2 }
 0x278   : > { %v1026_v49 = vadd.f32 %v1025_v6, %v1024_v43 }
 0x279   : > { %938 = vperm.xlu1 %1621, %v924_v32   ;;  %v1074_v32 = vld [vmem:[%s2407_s4 + $0x58] sm:$0xff] }
 0x27a   : > { %v1027_v5 = vrot.slane %v1026_v49, 1  ;;  %1107 = vmatprep.subr.mxu0 %v1074_v32 }
 0x27c   : > { %v1028_v3 = vadd.f32 %v1027_v5, %v1026_v49 }
 0x27d   : > { %948 = vperm.xlu1 %1621, %v926_v40   ;;  %v1073_v40 = vld [vmem:[%s2407_s4 + $0x50] sm:$0xff] }
 0x27e   : > { %v1044_v46 = vadd.f32 %v1043_v44, %v1028_v3  ;;  %1108 = vmatpush1.msra.mxu0 %v1073_v40 }
 0x27f   : > { %1109 = vmatprep.subr.mxu0 %v1072_v56 }
 0x280   : > { %v1046_v9 = vsel %vm1045_vm3, %v1044_v46, 1.0 }
 0x281   : > { %1686 = vrcp.f32 %v1046_v9  ;;  %958 = vperm.xlu1 %1621, %v928_v34   ;;  %v1071_v34 = vld [vmem:[%s2407_s4 + $0x40] sm:$0xff] }
 0x282   : > { %1110 = vmatpush1.msra.mxu0 %v1071_v34 }
 0x283   : > { %1111 = vmatprep.subr.mxu0 %v1070_v50 }
 0x284   : > { %1112 = vmatpush1.msra.mxu0 %v1069_v62 }
 0x285   : > { %968 = vperm.xlu1 %1621, %v930_v4   ;;  %1113 = vmatprep.subr.mxu0 %v1068_v18 }
 0x286   : > { %1114 = vmatpush1.msra.mxu0 %v1067_v30 }
 0x287   : > { %1115 = vmatprep.subr.mxu0 %v1066_v47 }
 0x288   : > { %1116 = vmatpush1.msra.mxu0 %v1065_v55 }
 0x289   : > { %1117 = vmatprep.subr.mxu0 %v1064_v17 }
 0x28a   : > { %1118 = vmatpush1.msra.mxu0 %v1063_v58 }
 0x28e   : > { %v1687_v60 = vpop.eup %1686 }
 0x28f   : > { %1051 = vperm.xlu0 %1620, %v1687_v60  }
 0x293   : > { %933 = vperm.xlu0 %1620, %v2157_v8   ;;  %v1169_v8 = vld [vmem:[%s2408_s5 + $0x28] sm:$0xff] }
 0x294   : > { %1208 = vmatprep.subr.mxu1 %v1169_v8 }
 0x297   : > { %943 = vperm.xlu0 %1620, %v2162_v24   ;;  %v1168_v24 = vld [vmem:[%s2408_s5 + $0x20] sm:$0xff] }
 0x298   : > { %1209 = vmatpush1.msra.mxu1 %v1168_v24 }
 0x29b   : > { %953 = vperm.xlu0 %1620, %v2170_v21   ;;  %v1167_v21 = vld [vmem:[%s2408_s5 + $0x18] sm:$0xff] }
 0x29c   : > { %1210 = vmatprep.subr.mxu1 %v1167_v21 }
 0x29f   : > { %963 = vperm.xlu0 %1620, %v2180_v61   ;;  %v1166_v61 = vld [vmem:[%s2408_s5 + $0x10] sm:$0xff] }
 0x2a0   : > { %1211 = vmatpush1.msra.mxu1 %v1166_v61 }
 0x2a1   : > { %1212 = vmatprep.subr.mxu1 %v1165_v11 }
 0x2a2   : > { %1213 = vmatpush1.msra.mxu1 %v1164_v2 }
 0x2a3   : > { %1039 = vperm.xlu0 %1620, %v1036_v63   ;;  %1514 = vmatprep.subr.mxu1 %v1776_v59 }
 0x2b6   : > { %v862_v14 = vpop.permute.xlu1 %861 }
 0x2b7   : > { %v895_v4 = vmul.f32 %v2015_v1, %v862_v14 }
 0x2b9   : > { %v903_v20 = vsel %vm742_vm0, %v895_v4, 0.0 }
 0x2ba   : > { %v857_v15 = vpop.permute.xlu0 %856 }
 0x2bb   : > { %v894_v41 = vmul.f32 %v2009_v12, %v857_v15 }
 0x2bd   : > { %v902_v26 = vsel %vm742_vm0, %v894_v41, 0.0 }
 0x2be   : > { %v904_v36 = vadd.f32 %v903_v20, %v902_v26 }
 0x2c4   : > { %v867_v29 = vpop.permute.xlu1 %866 }
 0x2c5   : > { %v896_v19 = vmul.f32 %v2032_v39, %v867_v29 }
 0x2c7   : > { %v905_v13 = vsel %vm742_vm0, %v896_v19, 0.0 }
 0x2c8   : > { %v872_v7 = vpop.permute.xlu1 %871  ;;  %v906_v6 = vadd.f32 %v905_v13, %v904_v36 }
 0x2c9   : > { %v897_v0 = vmul.f32 %v2037_v45, %v872_v7 }
 0x2cb   : > { %v907_v43 = vsel %vm742_vm0, %v897_v0, 0.0 }
 0x2cc   : > { %v908_v49 = vadd.f32 %v907_v43, %v906_v6 }
 0x2d2   : > { %v877_v52 = vpop.permute.xlu1 %876 }
 0x2d3   : > { %v898_v25 = vmul.f32 %v2055_v22, %v877_v52 }
 0x2d5   : > { %v909_v1 = vsel %vm742_vm0, %v898_v25, 0.0 }
 0x2d6   : > { %v910_v44 = vadd.f32 %v909_v1, %v908_v49 }
 0x2dc   : > { %v882_v27 = vpop.permute.xlu1 %881 }
 0x2dd   : > { %v899_v12 = vmul.f32 %v2065_v28, %v882_v27 }
 0x2df   : > { %v911_v45 = vsel %vm742_vm0, %v899_v12, 0.0 }
 0x2e0   : > { %v912_v53 = vadd.f32 %v911_v45, %v910_v44  ;;  %v1264_v45 = vld [vmem:[%s2409_s6 + $0x28] sm:$0xff]  ;;  %v1263_v44 = vld [vmem:[%s2409_s6 + $0x20] sm:$0xff] }
 0x2e4   : > { %v887_v39 = vpop.permute.xlu1 %886 }
 0x2e5   : > { %v900_v5 = vmul.f32 %v2069_v33, %v887_v39 }
 0x2e7   : > { %v913_v3 = vsel %vm742_vm0, %v900_v5, 0.0 }
 0x2e8   : > { %v892_v46 = vpop.permute.xlu1 %891  ;;  %v914_v9 = vadd.f32 %v913_v3, %v912_v53  ;;  %v1262_v3 = vld [vmem:[%s2409_s6 + $0x18] sm:$0xff]  ;;  %v1260_v53 = vld [vmem:[%s2409_s6 + $0x8] sm:$0xff] }
 0x2e9   : > { %v901_v22 = vmul.f32 %v2079_v38, %v892_v46  ;;  %v1261_v46 = vld [vmem:[%s2409_s6 + $0x10] sm:$0xff] }
 0x2eb   : > { %v915_v54 = vsel %vm742_vm0, %v901_v22, 0.0  ;;  %v1259_v22 = vld [vmem:[%s2409_s6] sm:$0xff] }
 0x2ec   : > { %v916_v28 = vadd.f32 %v915_v54, %v914_v9  ;;  %v1033_v34 = vpop.permute.xlu1 %1032 }
 0x2ee   : > { %v917_v32 = vrot.slane %v916_v28, 4 }
 0x2f0   : > { %v918_v40 = vadd.f32 %v917_v32, %v916_v28  ;;  %v1058_v62 = vpop.permute.xlu1 %1057 }
 0x2f1   : > { %vm1059_vm6 = vcmp.eq.s32.totalorder %v1058_v62, 1 }
 0x2f2   : > { %v919_v56 = vrot.slane %v918_v40, 2 }
 0x2f4   : > { %v920_v50 = vadd.f32 %v919_v56, %v918_v40  ;;  %v939_v30 = vpop.permute.xlu1 %938 }
 0x2f5   : > { %v972_v63 = vmul.f32 %v2017_v16, %v939_v30 }
 0x2f6   : > { %v921_v33 = vrot.slane %v920_v50, 1 }
 0x2f7   : > { %v980_v21 = vsel %vm767_vm1, %v972_v63, 0.0 }
 0x2f8   : > { %v922_v18 = vadd.f32 %v921_v33, %v920_v50  ;;  %v949_v58 = vpop.permute.xlu1 %948 }
 0x2f9   : > { %v974_v61 = vmul.f32 %v2049_v57, %v949_v58 }
 0x2fa   : > { %v1035_v47 = vadd.f32 %v1033_v34, %v922_v18 }
 0x2fb   : > { %v984_v7 = vsel %vm767_vm1, %v974_v61, 0.0 }
 0x2fc   : > { %v959_v8 = vpop.permute.xlu1 %958 }
 0x2fd   : > { %v976_v16 = vmul.f32 %v2071_v35, %v959_v8 }
 0x2ff   : > { %v988_v57 = vsel %vm767_vm1, %v976_v16, 0.0 }
 0x300   : > { %v969_v41 = vpop.permute.xlu1 %968 }
 0x30a   : > { %v1052_v55 = vpop.permute.xlu0 %1051 }
 0x30b   : > { %v1054_v17 = vmul.f32 %v1052_v55, %v1035_v47 }
 0x30d   : > { %v1060_v38 = vsel %vm1059_vm6, %v1054_v17, 0.019607844  ;;  %v1346_v17 = vld [vmem:[%s2411_s8] sm:$0xff] }
 0x30e   : > { %1487 = vmatmul.mubr.msk.f32.vlgmr.msra.gmra.mxu0 %vm742_vm0, %v1060_v38  ;;  %v934_v60 = vpop.permute.xlu0 %933 }
 0x30f   : > { %v971_v51 = vmul.f32 %v2026_v31, %v934_v60 }
 0x311   : > { %v979_v10 = vsel %vm767_vm1, %v971_v51, 0.0 }
 0x312   : > { %v944_v24 = vpop.permute.xlu0 %943  ;;  %v981_v2 = vadd.f32 %v980_v21, %v979_v10 }
 0x313   : > { %v973_v11 = vmul.f32 %v2040_v48, %v944_v24  ;;  %v978_v48 = vmul.f32 %v2085_v42, %v969_v41  ;;  %v1498_v24 = vld [vmem:[%s2410_s7] ss:$0 sm:$0xff] }
 0x315   : > { %v982_v14 = vsel %vm767_vm1, %v973_v11, 0.0  ;;  %v992_v35 = vsel %vm767_vm1, %v978_v48, 0.0 }
 0x316   : > { %v983_v29 = vadd.f32 %v982_v14, %v981_v2  ;;  %v954_v15 = vpop.permute.xlu0 %953 }
 0x317   : > { %v975_v31 = vmul.f32 %v2061_v23, %v954_v15 }
 0x318   : > { %v985_v52 = vadd.f32 %v984_v7, %v983_v29 }
 0x319   : > { %v986_v4 = vsel %vm767_vm1, %v975_v31, 0.0 }
 0x31a   : > { %v987_v19 = vadd.f32 %v986_v4, %v985_v52  ;;  %v964_v26 = vpop.permute.xlu0 %963 }
 0x31b   : > { %v977_v0 = vmul.f32 %v2077_v37, %v964_v26  ;;  %v1265_v37 = vld [vmem:[%s2409_s6 + $0x30] sm:$0x7] }
 0x31c   : > { %v989_v27 = vadd.f32 %v988_v57, %v987_v19 }
 0x31d   : > { %v990_v20 = vsel %vm767_vm1, %v977_v0, 0.0 }
 0x31e   : > { %v991_v13 = vadd.f32 %v990_v20, %v989_v27  ;;  %v1040_v39 = vpop.permute.xlu0 %1039 }
 0x320   : > { %v993_v25 = vadd.f32 %v992_v35, %v991_v13 }
 0x322   : > { %v994_v23 = vrot.slane %v993_v25, 4 }
 0x324   : > { %v995_v36 = vadd.f32 %v994_v23, %v993_v25 }
 0x326   : > { %v996_v43 = vrot.slane %v995_v36, 2 }
 0x328   : > { %v997_v12 = vadd.f32 %v996_v43, %v995_v36 }
 0x32a   : > { %v998_v6 = vrot.slane %v997_v12, 1 }
 0x32c   : > { %v999_v1 = vadd.f32 %v998_v6, %v997_v12 }
 0x32e   : > { %v1042_v49 = vadd.f32 %v1040_v39, %v999_v1 }
 0x330   : > { %v1061_v5 = vmul.f32 %v1052_v55, %v1042_v49  ;;  %v1347_v55 = vld [vmem:[%s2411_s8 + $0x8] sm:$0xff] }
 0x332   : > { %v1062_v42 = vsel %vm1059_vm6, %v1061_v5, 0.032258064 }
 0x333   : > { %1492 = vmatmul.mubr.msk.f32.vlgmr.msra.gmra.mxu1 %vm767_vm1, %v1062_v42 }
 0x334   : > { %1515 = vmatpush3.msk.msra.mxu1 %vm1080_vm4, %v1265_v37  ;;  %1528 = vmatprep.mubr.msk.f32.mxu1 %vm1777_vm7, %v1776_v59 }
 0x335   : > { %1516 = vmatprep.subr.mxu1 %v1776_v59 }
 0x336   : > { %1517 = vmatpush3.msra.mxu1 %v1264_v45 }
 0x337   : > { %1518 = vmatprep.subr.mxu1 %v1776_v59 }
 0x338   : > { %1519 = vmatpush3.msra.mxu1 %v1263_v44 }
 0x339   : > { %1520 = vmatprep.subr.mxu1 %v1776_v59 }
 0x33a   : > { %1521 = vmatpush3.msra.mxu1 %v1262_v3 }
 0x33b   : > { %1522 = vmatprep.subr.mxu1 %v1776_v59 }
 0x33c   : > { %1523 = vmatpush3.msra.mxu1 %v1261_v46 }
 0x33d   : > { %1524 = vmatprep.subr.mxu1 %v1776_v59 }
 0x33e   : > { %1525 = vmatpush3.msra.mxu1 %v1260_v53 }
 0x33f   : > { %1526 = vmatprep.subr.mxu1 %v1776_v59 }
 0x340   : > { %1527 = vmatpush3.msra.mxu1 %v1259_v22 }
 0x3ce   : > { %v1153_v9 = vpop.f32.mrf.mxu0 }
 0x3cf   : > { %1688 = vrcp.f32 %v1153_v9 }
 0x3d0   : > { %v1155_v28 = vpop.f32.mrf.mxu0 }
 0x3dc   : > { %v1689_v54 = vpop.eup %1688 }
 0x3dd   : > { %v1159_v32 = vmul.f32 %v1689_v54, %v1155_v28 }
 0x3df   : > { %v1160_v40 = vmul.f32 2.0, %v1159_v32 }
 0x3e1   : > { %v1488_v56 = vadd.f32 -1.0, %v1160_v40 }
 0x3e3   : > { %v1489_v34 = vclamps-f32 %v1488_v56, 1.0 }
 0x3e5   : > { %1529 = vmatmul.mubr.msk.f32.vlgmr.msra.gmra.mxu1 %vm742_vm0, %v1489_v34 }
 0x3f3   : > { %v1248_v50 = vpop.f32.mrf.mxu1 }
 0x3f4   : > { %1690 = vrcp.f32 %v1248_v50 }
 0x3f5   : > { %v1250_v33 = vpop.f32.mrf.mxu1 }
 0x401   : > { %v1691_v62 = vpop.eup %1690 }
 0x402   : > { %v1254_v18 = vmul.f32 %v1691_v62, %v1250_v33 }
 0x404   : > { %v1255_v30 = vmul.f32 2.0, %v1254_v18 }
 0x406   : > { %v1493_v47 = vadd.f32 -1.0, %v1255_v30 }
 0x408   : > { %v1494_v59 = vclamps-f32 %v1493_v47, 1.0 }
 0x40a   : > { %1345 = vst.msk [vmem:[#allocation3] sm:$0x1] %vm1344_vm8, %v1494_v59 }
 0x411   : > { %v1497_v58 = vld [vmem:[#allocation3] ss:$0 sm:$0xff] }
 0x412   : > { %v1356_v38 = vmul.f32 %v1497_v58, %v1347_v55  ;;  %v1355_v60 = vmul.f32 %v1497_v58, %v1346_v17 }
 0x414   : > { %v1361_v63 = vsel %vm767_vm1, %v1356_v38, 0.0  ;;  %v1358_v51 = vsel %vm767_vm1, %v1355_v60, 0.0 }
 0x415   : > { %1362 = vadd.xlane.f32.xlu0 %v1361_v63  ;;  %1359 = vadd.xlane.f32.xlu1 %v1358_v51 }
 0x49e   : > { %v1363_v21 = vpop.xlane.xlu0 %1362  ;;  %v1360_v61 = vpop.xlane.xlu1 %1359 }
 0x49f   : > { %v1373_v11 = vmul.f32 %v1498_v24, %v1363_v21  ;;  %v1372_v2 = vmul.f32 %v1498_v24, %v1360_v61 }
 0x4a5   : > { %v1338_v10 = vpop.f32.mrf.mxu1 }
 0x4a6   : > { %1343 = vst.msk [vmem:[#allocation2] sm:$0x1] %vm1342_vm9, %v1338_v10 }
 0x4a7   : > { %v1530_v8 = vpop.f32.mrf.mxu1 }
 0x4ad   : > { %v1499_v14 = vld [vmem:[#allocation2] ss:$0 sm:$0xff] }
 0x4ae   : > { %v1380_v29 = vadd.f32 %v1499_v14, %v1372_v2  ;;  %v1381_v15 = vadd.f32 %v1499_v14, %v1373_v11 }
 0x4b0   : > { %1383 = vst.msk [vmem:[%s340_s15] sm:$0xff] %vm1382_vm10, %v1380_v29  ;;  %1384 = vst.msk [vmem:[%s340_s15 + $0x8] sm:$0xff] %vm1382_vm10, %v1381_v15 }
 0x4b1   : > { %1705 = shalt.err (!%p1702_p3)
}
 0x4b2   : > { %s1706_s24 = scalar_lea.hbm %s2354_s20, 256  ;;  %s1710_s16 = scalar_lea.hbm %s2412_s9, 512 }
 0x4b3   : > { %p1707_p5 = scmp.ne.s32.totalorder %s2354_s20, %s1706_s24  ;;  %p1711_p9 = scmp.lt.s32.totalorder %s2354_s20, %s2412_s9 }
 0x4b4   : > { %p1712_p10 = scmp.lt.s32.totalorder %s1710_s16, %s1706_s24 }
 0x4b5   : > { %p1708_p6 = pnand %p1707_p5, %p1871_p4 }
 0x4b6   : > { %p1713_p11 = por %p1712_p10, %p1711_p9 }
 0x4b7   : > { %p1709_p7 = pneg %p1708_p6 }
 0x4b9   : > { %p1714_p12 = pnand %p1713_p11, %p1709_p7 }
 0x4bb   : > { %1717 = shalt.err (!%p1714_p12)
}
 0x4bc   : > { %s1779_s23 = smov 128   ;;  %s1780_s26 = smov 8  }
 0x4bd   : > { %1531 = dma.vmem_to_hbm [thread:$0]  (%p1871_p4), %s2356_s27, 256, %s2354_s20, %s2358_s12, %s1779_s23, %s1779_s23, %s1780_s26  }
 0x4be PF: > { %p1537_p13 = scmp.ge.s32.totalorder %s1768_s14, 2  ;;  %s1416_s28 = sand.u32 1, %s1748_s30  }
 0x4bf   : > { %s1417_s24 = scalar_lea.sflag [#allocation5], %s1416_s28 }
 0x4c0   : > { %p1534_p0 = pnand %p1537_p13, %p1878_p8 }
 0x4c2   : > { %p1535_p1 = pneg %p1534_p0 }
 0x4c4   : > { %1743 = dma.done.wait (%p1535_p1), %s1417_s24, 256  }
 0x4c5   : > { %1745 = vsyncadd (%p1535_p1), %s1417_s24, 4294967040  ;;  %s22_s14 = sadd.s32 1, %s1768_s14   ;;  %s2415_s30 = smov %s1752_s10 }
 0x4c6   : > { %p19_p2 = scmp.ge.s32.totalorder %s22_s14, 4   ;;  %s2416_s10 = smov %s1756_s11 }
 0x4c7   : > { %s2417_s11 = smov %s1884_s22  ;;  %s2418_s12 = smov %s1764_s13 }
 0x4c8   : > { %s2419_s13 = smov %s2421_s17  ;;  %21 = sbr.rel (!%p19_p2) target bundleno = 4 (0x4), region = 95 }
 0x4cd   :  { %1422 = vsyncpa [#allocation5], 1 }
 0x4ce   :  { %1424 = vsyncpa [#allocation5 + $0x1], 1 }

</bundles_post_ra>
